<compile_context>
chip_gen: v6e
topology: v6e:2x2x1
jax: 0.10.0
libtpu: 0.0.40
codegen_flags: <defaults>
</compile_context>

<pallas_src>
import functools
import math

import jax
import jax.numpy as jnp
from jax import lax
from jax.experimental import pallas as pl
from jax.experimental.pallas import tpu as pltpu

LN_EPS = 1e-12
PAD_TOKEN_ID = 1       # Roberta padding_idx (position ids use input_ids != pad)
NEG_BIG = -1e9         # additive attention bias for padded keys


# ---------------------------------------------------------------------------
# Parameter-slab layout: every tensor gets an 8-row-aligned block of a single
# [total_rows, 128] f32 slab -> ONE DMA for all weights, static slices in-kernel.
# ---------------------------------------------------------------------------
def build_layout(*, vocab, max_pos, H, inter, n_layers):
    layout = {}
    row = [0]

    def add(name, nrows, ncols):
        layout[name] = (row[0], nrows, ncols)
        row[0] += -(-nrows // 8) * 8            # 8-align every block start

    E_pad = -(-(vocab + max_pos + 2) // 8) * 8   # stacked word|pos|type table
    add("emb", E_pad, H)
    add("emb_ln_g", 1, H)
    add("emb_ln_b", 1, H)
    for l in range(n_layers):
        add(f"wqkv{l}", H, 3 * H)
        add(f"bqkv{l}", 1, 3 * H)
        add(f"wo{l}", H, H)
        add(f"bo{l}", 1, H)
        add(f"ln1g{l}", 1, H)
        add(f"ln1b{l}", 1, H)
        add(f"wi{l}", H, inter)
        add(f"bi{l}", 1, inter)
        add(f"wo2{l}", inter, H)
        add(f"bo2{l}", 1, H)
        add(f"ln2g{l}", 1, H)
        add(f"ln2b{l}", 1, H)
    add("wcls", 2 * H, 3)
    add("bcls", 1, 3)
    return layout, row[0]


# ---------------------------------------------------------------------------
# Single fused Pallas kernel: embedding (3-hot matmul) -> LN -> L encoder
# layers (fused QKV, attention, out-proj, FFN, residual LNs) -> classifier
# head with -inf special-token masking.  Everything resident in VMEM/vregs.
# ---------------------------------------------------------------------------
def fused_roberta_kernel(int_ref, amask_ref, p_ref, out_ref, ctx_ref, *,
                         layout, B, S, H, nH, n_layers, vocab, max_pos):
    BS = B * S
    dH = H // nH
    E_pad = layout["emb"][1]

    def P(name):
        r0, nr, nc = layout[name]
        return p_ref[r0:r0 + nr, 0:nc]

    def layer_norm(x, g, b):
        mu = jnp.mean(x, axis=-1, keepdims=True)
        var = jnp.mean((x - mu) ** 2, axis=-1, keepdims=True)
        return (x - mu) * lax.rsqrt(var + LN_EPS) * g + b

    def gelu(x):
        # TODO(synk): HF Roberta uses exact erf-based GELU; tanh approximation
        # used (erf has no guaranteed Mosaic lowering) -> ~1e-3 activation drift.
        return 0.5 * x * (1.0 + jnp.tanh(0.7978845608028654 * (x + 0.044715 * x * x * x)))

    # ---- packed integer inputs, column layout [BS, 1] -----------------------
    ic = int_ref[...]                                   # [BS, 4] int32
    ids_col = ic[:, 0:1]                                # input ids
    ttype_col = ic[:, 1:2]                              # token type ids
    stm_h_col = ic[:, 2:3]                              # special-token mask
    stm_t_col = ic[:, 3:4]                              # right-rotated stm

    # ---- Roberta position ids via block-lower-triangular cumsum matmul ------
    padmask = (ids_col != PAD_TOKEN_ID).astype(jnp.float32)        # [BS, 1]
    r_i = lax.broadcasted_iota(jnp.int32, (BS, BS), 0)
    c_i = lax.broadcasted_iota(jnp.int32, (BS, BS), 1)
    rb = jnp.floor(r_i.astype(jnp.float32) * (1.0 / S))            # batch id of row
    cb = jnp.floor(c_i.astype(jnp.float32) * (1.0 / S))            # batch id of col
    ltri = jnp.where((rb == cb) & (c_i <= r_i), 1.0, 0.0)          # [BS, BS]
    csum = jnp.dot(ltri, padmask, preferred_element_type=jnp.float32)
    pos_col = (csum * padmask).astype(jnp.int32) + 1               # [BS, 1]

    # ---- word + position + token-type embeddings as ONE 3-hot MXU matmul ----
    e_iota = lax.broadcasted_iota(jnp.int32, (BS, E_pad), 1)
    three_hot = ((e_iota == ids_col)
                 | (e_iota == (pos_col + vocab))
                 | (e_iota == (ttype_col + (vocab + max_pos)))).astype(jnp.float32)
    x = jnp.dot(three_hot, P("emb"), preferred_element_type=jnp.float32)   # [BS, H]
    x = layer_norm(x, P("emb_ln_g"), P("emb_ln_b"))

    # ---- additive attention bias rows (0 attended, NEG_BIG padded) ----------
    bias_rows = (amask_ref[...] - 1.0) * (-NEG_BIG)                # [B, S]; == (m-1)*1e9

    prev = x                                                       # hidden_states[-2]
    for l in range(n_layers):                                      # static unroll (2)
        prev = x
        # Fused QKV projection (attention scale already folded into Wq, bq).
        qkv = jnp.dot(x, P(f"wqkv{l}"), preferred_element_type=jnp.float32) + P(f"bqkv{l}")

        # Attention: static per-(batch, head) tiles, transpose-free Q·Kᵀ,
        # per-head context written straight into VMEM scratch.
        for b in range(B):
            bias_b = bias_rows[b:b + 1, :]                         # [1, S]
            r0 = b * S
            for h in range(nH):
                q = qkv[r0:r0 + S, h * dH:(h + 1) * dH]            # [S, dH]
                k = qkv[r0:r0 + S, H + h * dH:H + (h + 1) * dH]
                v = qkv[r0:r0 + S, 2 * H + h * dH:2 * H + (h + 1) * dH]
                s = lax.dot_general(q, k, (((1,), (1,)), ((), ())),
                                    preferred_element_type=jnp.float32) + bias_b
                m = jnp.max(s, axis=-1, keepdims=True)
                p = jnp.exp(s - m)
                p = p / jnp.sum(p, axis=-1, keepdims=True)         # exact softmax
                ctx_ref[r0:r0 + S, h * dH:(h + 1) * dH] = jnp.dot(
                    p, v, preferred_element_type=jnp.float32)

        # Output projection + residual + LayerNorm.
        attn = jnp.dot(ctx_ref[...], P(f"wo{l}"),
                       preferred_element_type=jnp.float32) + P(f"bo{l}")
        x = layer_norm(attn + x, P(f"ln1g{l}"), P(f"ln1b{l}"))

        # FFN + residual + LayerNorm.
        hmid = gelu(jnp.dot(x, P(f"wi{l}"), preferred_element_type=jnp.float32) + P(f"bi{l}"))
        ff = jnp.dot(hmid, P(f"wo2{l}"), preferred_element_type=jnp.float32) + P(f"bo2{l}")
        x = layer_norm(ff + x, P(f"ln2g{l}"), P(f"ln2b{l}"))

    # ---- classifier: cat((h_last, h_prev)) @ Wcls == h_last@Wa + h_prev@Wb ---
    r0, _, _ = layout["wcls"]
    w_a = p_ref[r0:r0 + H, 0:3]
    w_b = p_ref[r0 + H:r0 + 2 * H, 0:3]
    logits = (jnp.dot(x, w_a, preferred_element_type=jnp.float32)
              + jnp.dot(prev, w_b, preferred_element_type=jnp.float32)
              + P("bcls"))                                         # [BS, 3]

    # ---- head/tail -inf masking with a single iota-based where --------------
    col = lax.broadcasted_iota(jnp.int32, (BS, 3), 1)
    masked = ((col == 0) & (stm_h_col != 0)) | ((col == 1) & (stm_t_col != 0))
    out_ref[...] = jnp.where(masked, -jnp.inf, logits)


# ---------------------------------------------------------------------------
# Synthetic deterministic parameters, packed offline into the single slab.
# Attention scale 1/sqrt(dH) is folded into the Q projection here (zero cost).
# ---------------------------------------------------------------------------
def init_params(key, *, vocab, H, n_layers, inter, max_pos, n_heads):
    layout, total_rows = build_layout(vocab=vocab, max_pos=max_pos, H=H,
                                      inter=inter, n_layers=n_layers)
    state = {"key": key}

    def normal(shape, scale=0.02):
        state["key"], sub = jax.random.split(state["key"])
        return scale * jax.random.normal(sub, shape, dtype=jnp.float32)

    slab = jnp.zeros((total_rows, 128), jnp.float32)

    def put(name, val):
        nonlocal slab
        r0, _, _ = layout[name]
        val = jnp.asarray(val, jnp.float32)
        slab = slab.at[r0:r0 + val.shape[0], 0:val.shape[1]].set(val)

    # Stacked embedding table: word | position | token-type.
    emb_table = jnp.concatenate(
        [normal((vocab, H)), normal((max_pos, H)), normal((2, H))], axis=0)
    put("emb", emb_table)
    put("emb_ln_g", jnp.ones((1, H)))
    put("emb_ln_b", jnp.zeros((1, H)))

    dH = H // n_heads
    scale = 1.0 / math.sqrt(dH)
    for l in range(n_layers):
        wqkv = normal((H, 3 * H))
        bqkv = jnp.zeros((1, 3 * H), jnp.float32)
        wqkv = wqkv.at[:, :H].multiply(scale)     # fold 1/sqrt(dH) into Wq
        bqkv = bqkv.at[:, :H].multiply(scale)     # ... and into bq
        put(f"wqkv{l}", wqkv)
        put(f"bqkv{l}", bqkv)
        put(f"wo{l}", normal((H, H)))
        put(f"bo{l}", jnp.zeros((1, H)))
        put(f"ln1g{l}", jnp.ones((1, H)))
        put(f"ln1b{l}", jnp.zeros((1, H)))
        put(f"wi{l}", normal((H, inter)))
        put(f"bi{l}", jnp.zeros((1, inter)))
        put(f"wo2{l}", normal((inter, H)))
        put(f"bo2{l}", jnp.zeros((1, H)))
        put(f"ln2g{l}", jnp.ones((1, H)))
        put(f"ln2b{l}", jnp.zeros((1, H)))

    put("wcls", normal((2 * H, 3)))   # classifier_head_tail = Linear(2H, 3), stored as Wᵀ
    put("bcls", normal((1, 3)))
    return slab


# ---------------------------------------------------------------------------
# Forward pass: one tiny int-packing fusion in the wrapper, then ONE grid-less
# pallas_call with 3 VMEM operands (int columns, attention mask, param slab).
# ---------------------------------------------------------------------------
def model_forward(params_slab, input_ids, attention_mask, token_type_ids,
                  special_tokens_mask, *, cfg):
    vocab, max_pos = cfg["vocab"], cfg["max_pos"]
    H, inter = cfg["H"], cfg["inter"]
    n_layers, n_heads = cfg["n_layers"], cfg["n_heads"]
    B, S = input_ids.shape
    BS = B * S

    layout, _ = build_layout(vocab=vocab, max_pos=max_pos, H=H,
                             inter=inter, n_layers=n_layers)

    # Pack the integer inputs into one [BS, 4] column buffer (single DMA).
    stm = special_tokens_mask.astype(jnp.int32)
    stm_tail = jnp.roll(stm, shift=1, axis=1)        # cat([stm[:,-1:], stm[:,:-1]])
    int_cols = jnp.stack(
        [input_ids.astype(jnp.int32).reshape(-1),
         token_type_ids.astype(jnp.int32).reshape(-1),
         stm.reshape(-1),
         stm_tail.reshape(-1)], axis=1)              # [BS, 4]
    amask_f = attention_mask.astype(jnp.float32)     # [B, S]

    kernel = functools.partial(
        fused_roberta_kernel, layout=layout, B=B, S=S, H=H, nH=n_heads,
        n_layers=n_layers, vocab=vocab, max_pos=max_pos)

    vmem = pltpu.MemorySpace.VMEM
    logits = pl.pallas_call(
        kernel,
        out_shape=jax.ShapeDtypeStruct((BS, 3), jnp.float32),
        in_specs=[pl.BlockSpec(memory_space=vmem),
                  pl.BlockSpec(memory_space=vmem),
                  pl.BlockSpec(memory_space=vmem)],
        out_specs=pl.BlockSpec(memory_space=vmem),
        scratch_shapes=[pltpu.VMEM((BS, H), jnp.float32)],   # per-head context
    )(int_cols, amask_f, params_slab)

    logits = logits.reshape(B, S, 3)
    logits_head = logits[:, :, 0]            # [B, S]
    logits_tail = logits[:, :, 1]            # [B, S]
    logits_segmentation = logits[:, :, 2:3]  # [B, S, 1] (not squeezed, as in the module)
    return logits_head, logits_tail, logits_segmentation


# ---------------------------------------------------------------------------
if __name__ == "__main__":
    B, S, H = 2, 8, 32
    N_HEADS, N_LAYERS, INTER = 2, 2, 64
    VOCAB, MAX_POS = 100, 64
    # num_labels does not affect shapes in this module (classifier is Linear(2H, 3)).

    key = jax.random.PRNGKey(0)
    pkey, ikey = jax.random.split(key)
    params_slab = init_params(pkey, vocab=VOCAB, H=H, n_layers=N_LAYERS,
                              inter=INTER, max_pos=MAX_POS, n_heads=N_HEADS)

    input_ids = jax.random.randint(ikey, (B, S), 3, VOCAB, dtype=jnp.int32)
    attention_mask = jnp.ones((B, S), jnp.int32)
    token_type_ids = jnp.zeros((B, S), jnp.int32)
    # Mark first/last tokens as special (<s>, </s>) to exercise the -inf masking path.
    special_tokens_mask = jnp.zeros((B, S), jnp.int32).at[:, 0].set(1).at[:, -1].set(1)

    cfg = dict(vocab=VOCAB, max_pos=MAX_POS, H=H, inter=INTER,
               n_layers=N_LAYERS, n_heads=N_HEADS)
    fwd = jax.jit(functools.partial(model_forward, cfg=cfg))
    logits_head, logits_tail, logits_seg = fwd(
        params_slab, input_ids, attention_mask, token_type_ids, special_tokens_mask)
    jax.block_until_ready((logits_head, logits_tail, logits_seg))

    assert logits_head.shape == (B, S)
    assert logits_tail.shape == (B, S)
    assert logits_seg.shape == (B, S, 1)

    stm_b = special_tokens_mask.astype(bool)
    tail_stm_b = jnp.concatenate([stm_b[:, -1:], stm_b[:, :-1]], axis=1)
    # Masked positions are exactly -inf (PyTorch .where(mask==0, -inf) semantics);
    # unmasked positions and all segmentation logits are finite.
    assert bool(jnp.all(jnp.isneginf(jnp.where(stm_b, logits_head, -jnp.inf))))
    assert bool(jnp.all(jnp.isfinite(jnp.where(stm_b, 0.0, logits_head))))
    assert bool(jnp.all(jnp.isneginf(jnp.where(tail_stm_b, logits_tail, -jnp.inf))))
    assert bool(jnp.all(jnp.isfinite(jnp.where(tail_stm_b, 0.0, logits_tail))))
    assert bool(jnp.all(jnp.isfinite(logits_seg)))
    print("KERNEL_OK")
</pallas_src>

<mosaic_0001>
module attributes {stable_mosaic.version = 11 : i64} {
  func.func @fused_roberta_kernel(%arg0: memref<16x4xi32, #tpu.memory_space<vmem>>, %arg1: memref<2x8xf32, #tpu.memory_space<vmem>>, %arg2: memref<704x128xf32, #tpu.memory_space<vmem>>, %arg3: memref<16x3xf32, #tpu.memory_space<vmem>>, %arg4: memref<16x32xf32, #tpu.memory_space<vmem>>) attributes {dimension_semantics = [], scalar_prefetch = 0 : i64, scratch_operands = 1 : i64, tpu.core_type = #tpu.core_type<tc>} {
    %c0 = arith.constant 0 : index
    %c0_0 = arith.constant 0 : index
    %0 = vector.load %arg0[%c0, %c0_0] : memref<16x4xi32, #tpu.memory_space<vmem>>, vector<16x4xi32>
    %1 = vector.extract_strided_slice %0 {offsets = [0, 0], sizes = [16, 1], strides = [1, 1]} : vector<16x4xi32> to vector<16x1xi32>
    %2 = vector.extract_strided_slice %0 {offsets = [0, 1], sizes = [16, 1], strides = [1, 1]} : vector<16x4xi32> to vector<16x1xi32>
    %3 = vector.extract_strided_slice %0 {offsets = [0, 2], sizes = [16, 1], strides = [1, 1]} : vector<16x4xi32> to vector<16x1xi32>
    %4 = vector.extract_strided_slice %0 {offsets = [0, 3], sizes = [16, 1], strides = [1, 1]} : vector<16x4xi32> to vector<16x1xi32>
    %c1_i32 = arith.constant 1 : i32
    %5 = vector.broadcast %c1_i32 : i32 to vector<16x1xi32>
    %6 = arith.cmpi ne, %1, %5 : vector<16x1xi32>
    %7 = arith.extui %6 : vector<16x1xi1> to vector<16x1xi32>
    %8 = arith.sitofp %7 : vector<16x1xi32> to vector<16x1xf32>
    %9 = tpu.iota {dimensions = array<i32: 0>} : vector<16x16xi32>
    %10 = tpu.iota {dimensions = array<i32: 1>} : vector<16x16xi32>
    %11 = arith.sitofp %9 : vector<16x16xi32> to vector<16x16xf32>
    %cst = arith.constant 1.250000e-01 : f32
    %12 = vector.broadcast %cst : f32 to vector<16x16xf32>
    %13 = arith.mulf %11, %12 : vector<16x16xf32>
    %14 = math.floor %13 : vector<16x16xf32>
    %15 = arith.sitofp %10 : vector<16x16xi32> to vector<16x16xf32>
    %cst_1 = arith.constant 1.250000e-01 : f32
    %16 = vector.broadcast %cst_1 : f32 to vector<16x16xf32>
    %17 = arith.mulf %15, %16 : vector<16x16xf32>
    %18 = math.floor %17 : vector<16x16xf32>
    %19 = arith.cmpf oeq, %14, %18 : vector<16x16xf32>
    %20 = arith.cmpi sle, %10, %9 : vector<16x16xi32>
    %21 = arith.andi %19, %20 : vector<16x16xi1>
    %cst_2 = arith.constant 1.000000e+00 : f32
    %cst_3 = arith.constant 0.000000e+00 : f32
    %22 = vector.broadcast %cst_2 : f32 to vector<16x16xf32>
    %23 = vector.broadcast %cst_3 : f32 to vector<16x16xf32>
    %24 = arith.select %21, %22, %23 : vector<16x16xi1>, vector<16x16xf32>
    %cst_4 = arith.constant dense<0.000000e+00> : vector<16x1xf32>
    %25 = tpu.matmul %24, %8, %cst_4 {dimension_numbers = #tpu.dot_dimension_numbers<[1], [0], [0], [1], [0, 0, 1, 1], [], []>} : vector<16x16xf32>, vector<16x1xf32>, vector<16x1xf32> -> vector<16x1xf32>
    %26 = arith.mulf %25, %8 : vector<16x1xf32>
    %27 = arith.fptosi %26 : vector<16x1xf32> to vector<16x1xi32>
    %c1_i32_5 = arith.constant 1 : i32
    %28 = vector.broadcast %c1_i32_5 : i32 to vector<16x1xi32>
    %29 = arith.addi %27, %28 : vector<16x1xi32>
    %30 = tpu.iota {dimensions = array<i32: 1>} : vector<16x168xi32>
    %31 = vector.broadcast %1 : vector<16x1xi32> to vector<16x168xi32>
    %32 = arith.cmpi eq, %30, %31 : vector<16x168xi32>
    %c100_i32 = arith.constant 100 : i32
    %33 = vector.broadcast %c100_i32 : i32 to vector<16x1xi32>
    %34 = arith.addi %29, %33 : vector<16x1xi32>
    %35 = vector.broadcast %34 : vector<16x1xi32> to vector<16x168xi32>
    %36 = arith.cmpi eq, %30, %35 : vector<16x168xi32>
    %37 = arith.ori %32, %36 : vector<16x168xi1>
    %c164_i32 = arith.constant 164 : i32
    %38 = vector.broadcast %c164_i32 : i32 to vector<16x1xi32>
    %39 = arith.addi %2, %38 : vector<16x1xi32>
    %40 = vector.broadcast %39 : vector<16x1xi32> to vector<16x168xi32>
    %41 = arith.cmpi eq, %30, %40 : vector<16x168xi32>
    %42 = arith.ori %37, %41 : vector<16x168xi1>
    %43 = arith.extui %42 : vector<16x168xi1> to vector<16x168xi32>
    %44 = arith.sitofp %43 : vector<16x168xi32> to vector<16x168xf32>
    %c0_6 = arith.constant 0 : index
    %c0_7 = arith.constant 0 : index
    %45 = vector.load %arg2[%c0_6, %c0_7] : memref<704x128xf32, #tpu.memory_space<vmem>>, vector<168x32xf32>
    %cst_8 = arith.constant dense<0.000000e+00> : vector<16x32xf32>
    %46 = tpu.matmul %44, %45, %cst_8 {dimension_numbers = #tpu.dot_dimension_numbers<[1], [0], [0], [1], [0, 0, 1, 1], [], []>} : vector<16x168xf32>, vector<168x32xf32>, vector<16x32xf32> -> vector<16x32xf32>
    %c168 = arith.constant 168 : index
    %c0_9 = arith.constant 0 : index
    %47 = vector.load %arg2[%c168, %c0_9] : memref<704x128xf32, #tpu.memory_space<vmem>>, vector<1x32xf32>
    %c176 = arith.constant 176 : index
    %c0_10 = arith.constant 0 : index
    %48 = vector.load %arg2[%c176, %c0_10] : memref<704x128xf32, #tpu.memory_space<vmem>>, vector<1x32xf32>
    %cst_11 = arith.constant dense<0.000000e+00> : vector<16xf32>
    %49 = vector.multi_reduction <add>, %46, %cst_11 [1] : vector<16x32xf32> to vector<16xf32>
    %50 = vector.shape_cast %49 : vector<16xf32> to vector<16x1xf32>
    %cst_12 = arith.constant 3.200000e+01 : f32
    %51 = vector.broadcast %cst_12 : f32 to vector<16x1xf32>
    %52 = arith.divf %50, %51 : vector<16x1xf32>
    %53 = vector.broadcast %52 : vector<16x1xf32> to vector<16x32xf32>
    %54 = arith.subf %46, %53 : vector<16x32xf32>
    %55 = arith.mulf %54, %54 : vector<16x32xf32>
    %cst_13 = arith.constant dense<0.000000e+00> : vector<16xf32>
    %56 = vector.multi_reduction <add>, %55, %cst_13 [1] : vector<16x32xf32> to vector<16xf32>
    %57 = vector.shape_cast %56 : vector<16xf32> to vector<16x1xf32>
    %cst_14 = arith.constant 3.200000e+01 : f32
    %58 = vector.broadcast %cst_14 : f32 to vector<16x1xf32>
    %59 = arith.divf %57, %58 : vector<16x1xf32>
    %60 = vector.broadcast %52 : vector<16x1xf32> to vector<16x32xf32>
    %61 = arith.subf %46, %60 : vector<16x32xf32>
    %cst_15 = arith.constant 9.99999996E-13 : f32
    %62 = vector.broadcast %cst_15 : f32 to vector<16x1xf32>
    %63 = arith.addf %59, %62 : vector<16x1xf32>
    %64 = math.rsqrt %63 : vector<16x1xf32>
    %65 = vector.broadcast %64 : vector<16x1xf32> to vector<16x32xf32>
    %66 = arith.mulf %61, %65 : vector<16x32xf32>
    %67 = vector.broadcast %47 : vector<1x32xf32> to vector<16x32xf32>
    %68 = arith.mulf %66, %67 : vector<16x32xf32>
    %69 = vector.broadcast %48 : vector<1x32xf32> to vector<16x32xf32>
    %70 = arith.addf %68, %69 : vector<16x32xf32>
    %c0_16 = arith.constant 0 : index
    %c0_17 = arith.constant 0 : index
    %71 = vector.load %arg1[%c0_16, %c0_17] : memref<2x8xf32, #tpu.memory_space<vmem>>, vector<2x8xf32>
    %cst_18 = arith.constant 1.000000e+00 : f32
    %72 = vector.broadcast %cst_18 : f32 to vector<2x8xf32>
    %73 = arith.subf %71, %72 : vector<2x8xf32>
    %cst_19 = arith.constant 1.000000e+09 : f32
    %74 = vector.broadcast %cst_19 : f32 to vector<2x8xf32>
    %75 = arith.mulf %73, %74 : vector<2x8xf32>
    %c184 = arith.constant 184 : index
    %c0_20 = arith.constant 0 : index
    %76 = vector.load %arg2[%c184, %c0_20] : memref<704x128xf32, #tpu.memory_space<vmem>>, vector<32x96xf32>
    %cst_21 = arith.constant dense<0.000000e+00> : vector<16x96xf32>
    %77 = tpu.matmul %70, %76, %cst_21 {dimension_numbers = #tpu.dot_dimension_numbers<[1], [0], [0], [1], [0, 0, 1, 1], [], []>} : vector<16x32xf32>, vector<32x96xf32>, vector<16x96xf32> -> vector<16x96xf32>
    %c216 = arith.constant 216 : index
    %c0_22 = arith.constant 0 : index
    %78 = vector.load %arg2[%c216, %c0_22] : memref<704x128xf32, #tpu.memory_space<vmem>>, vector<1x96xf32>
    %79 = vector.broadcast %78 : vector<1x96xf32> to vector<16x96xf32>
    %80 = arith.addf %77, %79 : vector<16x96xf32>
    %81 = vector.extract_strided_slice %75 {offsets = [0, 0], sizes = [1, 8], strides = [1, 1]} : vector<2x8xf32> to vector<1x8xf32>
    %82 = vector.extract_strided_slice %80 {offsets = [0, 0], sizes = [8, 16], strides = [1, 1]} : vector<16x96xf32> to vector<8x16xf32>
    %83 = vector.extract_strided_slice %80 {offsets = [0, 32], sizes = [8, 16], strides = [1, 1]} : vector<16x96xf32> to vector<8x16xf32>
    %84 = vector.extract_strided_slice %80 {offsets = [0, 64], sizes = [8, 16], strides = [1, 1]} : vector<16x96xf32> to vector<8x16xf32>
    %cst_23 = arith.constant dense<0.000000e+00> : vector<8x8xf32>
    %85 = tpu.matmul %82, %83, %cst_23 {dimension_numbers = #tpu.dot_dimension_numbers<[1], [1], [0], [0], [0, 0, 1, 0], [], []>} : vector<8x16xf32>, vector<8x16xf32>, vector<8x8xf32> -> vector<8x8xf32>
    %86 = vector.broadcast %81 : vector<1x8xf32> to vector<8x8xf32>
    %87 = arith.addf %85, %86 : vector<8x8xf32>
    %cst_24 = arith.constant dense<0xFF800000> : vector<8xf32>
    %88 = vector.multi_reduction <maximumf>, %87, %cst_24 [1] : vector<8x8xf32> to vector<8xf32>
    %89 = vector.shape_cast %88 : vector<8xf32> to vector<8x1xf32>
    %90 = vector.broadcast %89 : vector<8x1xf32> to vector<8x8xf32>
    %91 = arith.subf %87, %90 : vector<8x8xf32>
    %92 = math.exp %91 : vector<8x8xf32>
    %cst_25 = arith.constant dense<0.000000e+00> : vector<8xf32>
    %93 = vector.multi_reduction <add>, %92, %cst_25 [1] : vector<8x8xf32> to vector<8xf32>
    %94 = vector.shape_cast %93 : vector<8xf32> to vector<8x1xf32>
    %95 = vector.broadcast %94 : vector<8x1xf32> to vector<8x8xf32>
    %96 = arith.divf %92, %95 : vector<8x8xf32>
    %cst_26 = arith.constant dense<0.000000e+00> : vector<8x16xf32>
    %97 = tpu.matmul %96, %84, %cst_26 {dimension_numbers = #tpu.dot_dimension_numbers<[1], [0], [0], [1], [0, 0, 1, 1], [], []>} : vector<8x8xf32>, vector<8x16xf32>, vector<8x16xf32> -> vector<8x16xf32>
    %c0_27 = arith.constant 0 : index
    %c0_28 = arith.constant 0 : index
    %98 = vector.load %arg4[%c0_27, %c0_28] : memref<16x32xf32, #tpu.memory_space<vmem>>, vector<8x16xf32>
    tpu.vector_store %arg4[%c0_27, %c0_28], %97 {strides = array<i32>} : memref<16x32xf32, #tpu.memory_space<vmem>>, vector<8x16xf32>,
    %99 = vector.extract_strided_slice %80 {offsets = [0, 16], sizes = [8, 16], strides = [1, 1]} : vector<16x96xf32> to vector<8x16xf32>
    %100 = vector.extract_strided_slice %80 {offsets = [0, 48], sizes = [8, 16], strides = [1, 1]} : vector<16x96xf32> to vector<8x16xf32>
    %101 = vector.extract_strided_slice %80 {offsets = [0, 80], sizes = [8, 16], strides = [1, 1]} : vector<16x96xf32> to vector<8x16xf32>
    %cst_29 = arith.constant dense<0.000000e+00> : vector<8x8xf32>
    %102 = tpu.matmul %99, %100, %cst_29 {dimension_numbers = #tpu.dot_dimension_numbers<[1], [1], [0], [0], [0, 0, 1, 0], [], []>} : vector<8x16xf32>, vector<8x16xf32>, vector<8x8xf32> -> vector<8x8xf32>
    %103 = vector.broadcast %81 : vector<1x8xf32> to vector<8x8xf32>
    %104 = arith.addf %102, %103 : vector<8x8xf32>
    %cst_30 = arith.constant dense<0xFF800000> : vector<8xf32>
    %105 = vector.multi_reduction <maximumf>, %104, %cst_30 [1] : vector<8x8xf32> to vector<8xf32>
    %106 = vector.shape_cast %105 : vector<8xf32> to vector<8x1xf32>
    %107 = vector.broadcast %106 : vector<8x1xf32> to vector<8x8xf32>
    %108 = arith.subf %104, %107 : vector<8x8xf32>
    %109 = math.exp %108 : vector<8x8xf32>
    %cst_31 = arith.constant dense<0.000000e+00> : vector<8xf32>
    %110 = vector.multi_reduction <add>, %109, %cst_31 [1] : vector<8x8xf32> to vector<8xf32>
    %111 = vector.shape_cast %110 : vector<8xf32> to vector<8x1xf32>
    %112 = vector.broadcast %111 : vector<8x1xf32> to vector<8x8xf32>
    %113 = arith.divf %109, %112 : vector<8x8xf32>
    %cst_32 = arith.constant dense<0.000000e+00> : vector<8x16xf32>
    %114 = tpu.matmul %113, %101, %cst_32 {dimension_numbers = #tpu.dot_dimension_numbers<[1], [0], [0], [1], [0, 0, 1, 1], [], []>} : vector<8x8xf32>, vector<8x16xf32>, vector<8x16xf32> -> vector<8x16xf32>
    %c0_33 = arith.constant 0 : index
    %c16 = arith.constant 16 : index
    %115 = vector.load %arg4[%c0_33, %c16] : memref<16x32xf32, #tpu.memory_space<vmem>>, vector<8x16xf32>
    tpu.vector_store %arg4[%c0_33, %c16], %114 {strides = array<i32>} : memref<16x32xf32, #tpu.memory_space<vmem>>, vector<8x16xf32>,
    %116 = vector.extract_strided_slice %75 {offsets = [1, 0], sizes = [1, 8], strides = [1, 1]} : vector<2x8xf32> to vector<1x8xf32>
    %117 = vector.extract_strided_slice %80 {offsets = [8, 0], sizes = [8, 16], strides = [1, 1]} : vector<16x96xf32> to vector<8x16xf32>
    %118 = vector.extract_strided_slice %80 {offsets = [8, 32], sizes = [8, 16], strides = [1, 1]} : vector<16x96xf32> to vector<8x16xf32>
    %119 = vector.extract_strided_slice %80 {offsets = [8, 64], sizes = [8, 16], strides = [1, 1]} : vector<16x96xf32> to vector<8x16xf32>
    %cst_34 = arith.constant dense<0.000000e+00> : vector<8x8xf32>
    %120 = tpu.matmul %117, %118, %cst_34 {dimension_numbers = #tpu.dot_dimension_numbers<[1], [1], [0], [0], [0, 0, 1, 0], [], []>} : vector<8x16xf32>, vector<8x16xf32>, vector<8x8xf32> -> vector<8x8xf32>
    %121 = vector.broadcast %116 : vector<1x8xf32> to vector<8x8xf32>
    %122 = arith.addf %120, %121 : vector<8x8xf32>
    %cst_35 = arith.constant dense<0xFF800000> : vector<8xf32>
    %123 = vector.multi_reduction <maximumf>, %122, %cst_35 [1] : vector<8x8xf32> to vector<8xf32>
    %124 = vector.shape_cast %123 : vector<8xf32> to vector<8x1xf32>
    %125 = vector.broadcast %124 : vector<8x1xf32> to vector<8x8xf32>
    %126 = arith.subf %122, %125 : vector<8x8xf32>
    %127 = math.exp %126 : vector<8x8xf32>
    %cst_36 = arith.constant dense<0.000000e+00> : vector<8xf32>
    %128 = vector.multi_reduction <add>, %127, %cst_36 [1] : vector<8x8xf32> to vector<8xf32>
    %129 = vector.shape_cast %128 : vector<8xf32> to vector<8x1xf32>
    %130 = vector.broadcast %129 : vector<8x1xf32> to vector<8x8xf32>
    %131 = arith.divf %127, %130 : vector<8x8xf32>
    %cst_37 = arith.constant dense<0.000000e+00> : vector<8x16xf32>
    %132 = tpu.matmul %131, %119, %cst_37 {dimension_numbers = #tpu.dot_dimension_numbers<[1], [0], [0], [1], [0, 0, 1, 1], [], []>} : vector<8x8xf32>, vector<8x16xf32>, vector<8x16xf32> -> vector<8x16xf32>
    %c8 = arith.constant 8 : index
    %c0_38 = arith.constant 0 : index
    %133 = vector.load %arg4[%c8, %c0_38] : memref<16x32xf32, #tpu.memory_space<vmem>>, vector<8x16xf32>
    tpu.vector_store %arg4[%c8, %c0_38], %132 {strides = array<i32>} : memref<16x32xf32, #tpu.memory_space<vmem>>, vector<8x16xf32>,
    %134 = vector.extract_strided_slice %80 {offsets = [8, 16], sizes = [8, 16], strides = [1, 1]} : vector<16x96xf32> to vector<8x16xf32>
    %135 = vector.extract_strided_slice %80 {offsets = [8, 48], sizes = [8, 16], strides = [1, 1]} : vector<16x96xf32> to vector<8x16xf32>
    %136 = vector.extract_strided_slice %80 {offsets = [8, 80], sizes = [8, 16], strides = [1, 1]} : vector<16x96xf32> to vector<8x16xf32>
    %cst_39 = arith.constant dense<0.000000e+00> : vector<8x8xf32>
    %137 = tpu.matmul %134, %135, %cst_39 {dimension_numbers = #tpu.dot_dimension_numbers<[1], [1], [0], [0], [0, 0, 1, 0], [], []>} : vector<8x16xf32>, vector<8x16xf32>, vector<8x8xf32> -> vector<8x8xf32>
    %138 = vector.broadcast %116 : vector<1x8xf32> to vector<8x8xf32>
    %139 = arith.addf %137, %138 : vector<8x8xf32>
    %cst_40 = arith.constant dense<0xFF800000> : vector<8xf32>
    %140 = vector.multi_reduction <maximumf>, %139, %cst_40 [1] : vector<8x8xf32> to vector<8xf32>
    %141 = vector.shape_cast %140 : vector<8xf32> to vector<8x1xf32>
    %142 = vector.broadcast %141 : vector<8x1xf32> to vector<8x8xf32>
    %143 = arith.subf %139, %142 : vector<8x8xf32>
    %144 = math.exp %143 : vector<8x8xf32>
    %cst_41 = arith.constant dense<0.000000e+00> : vector<8xf32>
    %145 = vector.multi_reduction <add>, %144, %cst_41 [1] : vector<8x8xf32> to vector<8xf32>
    %146 = vector.shape_cast %145 : vector<8xf32> to vector<8x1xf32>
    %147 = vector.broadcast %146 : vector<8x1xf32> to vector<8x8xf32>
    %148 = arith.divf %144, %147 : vector<8x8xf32>
    %cst_42 = arith.constant dense<0.000000e+00> : vector<8x16xf32>
    %149 = tpu.matmul %148, %136, %cst_42 {dimension_numbers = #tpu.dot_dimension_numbers<[1], [0], [0], [1], [0, 0, 1, 1], [], []>} : vector<8x8xf32>, vector<8x16xf32>, vector<8x16xf32> -> vector<8x16xf32>
    %c8_43 = arith.constant 8 : index
    %c16_44 = arith.constant 16 : index
    %150 = vector.load %arg4[%c8_43, %c16_44] : memref<16x32xf32, #tpu.memory_space<vmem>>, vector<8x16xf32>
    tpu.vector_store %arg4[%c8_43, %c16_44], %149 {strides = array<i32>} : memref<16x32xf32, #tpu.memory_space<vmem>>, vector<8x16xf32>,
    %c0_45 = arith.constant 0 : index
    %c0_46 = arith.constant 0 : index
    %151 = vector.load %arg4[%c0_45, %c0_46] : memref<16x32xf32, #tpu.memory_space<vmem>>, vector<16x32xf32>
    %c224 = arith.constant 224 : index
    %c0_47 = arith.constant 0 : index
    %152 = vector.load %arg2[%c224, %c0_47] : memref<704x128xf32, #tpu.memory_space<vmem>>, vector<32x32xf32>
    %cst_48 = arith.constant dense<0.000000e+00> : vector<16x32xf32>
    %153 = tpu.matmul %151, %152, %cst_48 {dimension_numbers = #tpu.dot_dimension_numbers<[1], [0], [0], [1], [0, 0, 1, 1], [], []>} : vector<16x32xf32>, vector<32x32xf32>, vector<16x32xf32> -> vector<16x32xf32>
    %c256 = arith.constant 256 : index
    %c0_49 = arith.constant 0 : index
    %154 = vector.load %arg2[%c256, %c0_49] : memref<704x128xf32, #tpu.memory_space<vmem>>, vector<1x32xf32>
    %155 = vector.broadcast %154 : vector<1x32xf32> to vector<16x32xf32>
    %156 = arith.addf %153, %155 : vector<16x32xf32>
    %157 = arith.addf %156, %70 : vector<16x32xf32>
    %c264 = arith.constant 264 : index
    %c0_50 = arith.constant 0 : index
    %158 = vector.load %arg2[%c264, %c0_50] : memref<704x128xf32, #tpu.memory_space<vmem>>, vector<1x32xf32>
    %c272 = arith.constant 272 : index
    %c0_51 = arith.constant 0 : index
    %159 = vector.load %arg2[%c272, %c0_51] : memref<704x128xf32, #tpu.memory_space<vmem>>, vector<1x32xf32>
    %cst_52 = arith.constant dense<0.000000e+00> : vector<16xf32>
    %160 = vector.multi_reduction <add>, %157, %cst_52 [1] : vector<16x32xf32> to vector<16xf32>
    %161 = vector.shape_cast %160 : vector<16xf32> to vector<16x1xf32>
    %cst_53 = arith.constant 3.200000e+01 : f32
    %162 = vector.broadcast %cst_53 : f32 to vector<16x1xf32>
    %163 = arith.divf %161, %162 : vector<16x1xf32>
    %164 = vector.broadcast %163 : vector<16x1xf32> to vector<16x32xf32>
    %165 = arith.subf %157, %164 : vector<16x32xf32>
    %166 = arith.mulf %165, %165 : vector<16x32xf32>
    %cst_54 = arith.constant dense<0.000000e+00> : vector<16xf32>
    %167 = vector.multi_reduction <add>, %166, %cst_54 [1] : vector<16x32xf32> to vector<16xf32>
    %168 = vector.shape_cast %167 : vector<16xf32> to vector<16x1xf32>
    %cst_55 = arith.constant 3.200000e+01 : f32
    %169 = vector.broadcast %cst_55 : f32 to vector<16x1xf32>
    %170 = arith.divf %168, %169 : vector<16x1xf32>
    %171 = vector.broadcast %163 : vector<16x1xf32> to vector<16x32xf32>
    %172 = arith.subf %157, %171 : vector<16x32xf32>
    %cst_56 = arith.constant 9.99999996E-13 : f32
    %173 = vector.broadcast %cst_56 : f32 to vector<16x1xf32>
    %174 = arith.addf %170, %173 : vector<16x1xf32>
    %175 = math.rsqrt %174 : vector<16x1xf32>
    %176 = vector.broadcast %175 : vector<16x1xf32> to vector<16x32xf32>
    %177 = arith.mulf %172, %176 : vector<16x32xf32>
    %178 = vector.broadcast %158 : vector<1x32xf32> to vector<16x32xf32>
    %179 = arith.mulf %177, %178 : vector<16x32xf32>
    %180 = vector.broadcast %159 : vector<1x32xf32> to vector<16x32xf32>
    %181 = arith.addf %179, %180 : vector<16x32xf32>
    %c280 = arith.constant 280 : index
    %c0_57 = arith.constant 0 : index
    %182 = vector.load %arg2[%c280, %c0_57] : memref<704x128xf32, #tpu.memory_space<vmem>>, vector<32x64xf32>
    %cst_58 = arith.constant dense<0.000000e+00> : vector<16x64xf32>
    %183 = tpu.matmul %181, %182, %cst_58 {dimension_numbers = #tpu.dot_dimension_numbers<[1], [0], [0], [1], [0, 0, 1, 1], [], []>} : vector<16x32xf32>, vector<32x64xf32>, vector<16x64xf32> -> vector<16x64xf32>
    %c312 = arith.constant 312 : index
    %c0_59 = arith.constant 0 : index
    %184 = vector.load %arg2[%c312, %c0_59] : memref<704x128xf32, #tpu.memory_space<vmem>>, vector<1x64xf32>
    %185 = vector.broadcast %184 : vector<1x64xf32> to vector<16x64xf32>
    %186 = arith.addf %183, %185 : vector<16x64xf32>
    %cst_60 = arith.constant 5.000000e-01 : f32
    %187 = vector.broadcast %cst_60 : f32 to vector<16x64xf32>
    %188 = arith.mulf %187, %186 : vector<16x64xf32>
    %cst_61 = arith.constant 4.471500e-02 : f32
    %189 = vector.broadcast %cst_61 : f32 to vector<16x64xf32>
    %190 = arith.mulf %189, %186 : vector<16x64xf32>
    %191 = arith.mulf %190, %186 : vector<16x64xf32>
    %192 = arith.mulf %191, %186 : vector<16x64xf32>
    %193 = arith.addf %186, %192 : vector<16x64xf32>
    %cst_62 = arith.constant 0.797884583 : f32
    %194 = vector.broadcast %cst_62 : f32 to vector<16x64xf32>
    %195 = arith.mulf %194, %193 : vector<16x64xf32>
    %196 = math.tanh %195 : vector<16x64xf32>
    %cst_63 = arith.constant 1.000000e+00 : f32
    %197 = vector.broadcast %cst_63 : f32 to vector<16x64xf32>
    %198 = arith.addf %197, %196 : vector<16x64xf32>
    %199 = arith.mulf %188, %198 : vector<16x64xf32>
    %c320 = arith.constant 320 : index
    %c0_64 = arith.constant 0 : index
    %200 = vector.load %arg2[%c320, %c0_64] : memref<704x128xf32, #tpu.memory_space<vmem>>, vector<64x32xf32>
    %cst_65 = arith.constant dense<0.000000e+00> : vector<16x32xf32>
    %201 = tpu.matmul %199, %200, %cst_65 {dimension_numbers = #tpu.dot_dimension_numbers<[1], [0], [0], [1], [0, 0, 1, 1], [], []>} : vector<16x64xf32>, vector<64x32xf32>, vector<16x32xf32> -> vector<16x32xf32>
    %c384 = arith.constant 384 : index
    %c0_66 = arith.constant 0 : index
    %202 = vector.load %arg2[%c384, %c0_66] : memref<704x128xf32, #tpu.memory_space<vmem>>, vector<1x32xf32>
    %203 = vector.broadcast %202 : vector<1x32xf32> to vector<16x32xf32>
    %204 = arith.addf %201, %203 : vector<16x32xf32>
    %205 = arith.addf %204, %181 : vector<16x32xf32>
    %c392 = arith.constant 392 : index
    %c0_67 = arith.constant 0 : index
    %206 = vector.load %arg2[%c392, %c0_67] : memref<704x128xf32, #tpu.memory_space<vmem>>, vector<1x32xf32>
    %c400 = arith.constant 400 : index
    %c0_68 = arith.constant 0 : index
    %207 = vector.load %arg2[%c400, %c0_68] : memref<704x128xf32, #tpu.memory_space<vmem>>, vector<1x32xf32>
    %cst_69 = arith.constant dense<0.000000e+00> : vector<16xf32>
    %208 = vector.multi_reduction <add>, %205, %cst_69 [1] : vector<16x32xf32> to vector<16xf32>
    %209 = vector.shape_cast %208 : vector<16xf32> to vector<16x1xf32>
    %cst_70 = arith.constant 3.200000e+01 : f32
    %210 = vector.broadcast %cst_70 : f32 to vector<16x1xf32>
    %211 = arith.divf %209, %210 : vector<16x1xf32>
    %212 = vector.broadcast %211 : vector<16x1xf32> to vector<16x32xf32>
    %213 = arith.subf %205, %212 : vector<16x32xf32>
    %214 = arith.mulf %213, %213 : vector<16x32xf32>
    %cst_71 = arith.constant dense<0.000000e+00> : vector<16xf32>
    %215 = vector.multi_reduction <add>, %214, %cst_71 [1] : vector<16x32xf32> to vector<16xf32>
    %216 = vector.shape_cast %215 : vector<16xf32> to vector<16x1xf32>
    %cst_72 = arith.constant 3.200000e+01 : f32
    %217 = vector.broadcast %cst_72 : f32 to vector<16x1xf32>
    %218 = arith.divf %216, %217 : vector<16x1xf32>
    %219 = vector.broadcast %211 : vector<16x1xf32> to vector<16x32xf32>
    %220 = arith.subf %205, %219 : vector<16x32xf32>
    %cst_73 = arith.constant 9.99999996E-13 : f32
    %221 = vector.broadcast %cst_73 : f32 to vector<16x1xf32>
    %222 = arith.addf %218, %221 : vector<16x1xf32>
    %223 = math.rsqrt %222 : vector<16x1xf32>
    %224 = vector.broadcast %223 : vector<16x1xf32> to vector<16x32xf32>
    %225 = arith.mulf %220, %224 : vector<16x32xf32>
    %226 = vector.broadcast %206 : vector<1x32xf32> to vector<16x32xf32>
    %227 = arith.mulf %225, %226 : vector<16x32xf32>
    %228 = vector.broadcast %207 : vector<1x32xf32> to vector<16x32xf32>
    %229 = arith.addf %227, %228 : vector<16x32xf32>
    %c408 = arith.constant 408 : index
    %c0_74 = arith.constant 0 : index
    %230 = vector.load %arg2[%c408, %c0_74] : memref<704x128xf32, #tpu.memory_space<vmem>>, vector<32x96xf32>
    %cst_75 = arith.constant dense<0.000000e+00> : vector<16x96xf32>
    %231 = tpu.matmul %229, %230, %cst_75 {dimension_numbers = #tpu.dot_dimension_numbers<[1], [0], [0], [1], [0, 0, 1, 1], [], []>} : vector<16x32xf32>, vector<32x96xf32>, vector<16x96xf32> -> vector<16x96xf32>
    %c440 = arith.constant 440 : index
    %c0_76 = arith.constant 0 : index
    %232 = vector.load %arg2[%c440, %c0_76] : memref<704x128xf32, #tpu.memory_space<vmem>>, vector<1x96xf32>
    %233 = vector.broadcast %232 : vector<1x96xf32> to vector<16x96xf32>
    %234 = arith.addf %231, %233 : vector<16x96xf32>
    %235 = vector.extract_strided_slice %75 {offsets = [0, 0], sizes = [1, 8], strides = [1, 1]} : vector<2x8xf32> to vector<1x8xf32>
    %236 = vector.extract_strided_slice %234 {offsets = [0, 0], sizes = [8, 16], strides = [1, 1]} : vector<16x96xf32> to vector<8x16xf32>
    %237 = vector.extract_strided_slice %234 {offsets = [0, 32], sizes = [8, 16], strides = [1, 1]} : vector<16x96xf32> to vector<8x16xf32>
    %238 = vector.extract_strided_slice %234 {offsets = [0, 64], sizes = [8, 16], strides = [1, 1]} : vector<16x96xf32> to vector<8x16xf32>
    %cst_77 = arith.constant dense<0.000000e+00> : vector<8x8xf32>
    %239 = tpu.matmul %236, %237, %cst_77 {dimension_numbers = #tpu.dot_dimension_numbers<[1], [1], [0], [0], [0, 0, 1, 0], [], []>} : vector<8x16xf32>, vector<8x16xf32>, vector<8x8xf32> -> vector<8x8xf32>
    %240 = vector.broadcast %235 : vector<1x8xf32> to vector<8x8xf32>
    %241 = arith.addf %239, %240 : vector<8x8xf32>
    %cst_78 = arith.constant dense<0xFF800000> : vector<8xf32>
    %242 = vector.multi_reduction <maximumf>, %241, %cst_78 [1] : vector<8x8xf32> to vector<8xf32>
    %243 = vector.shape_cast %242 : vector<8xf32> to vector<8x1xf32>
    %244 = vector.broadcast %243 : vector<8x1xf32> to vector<8x8xf32>
    %245 = arith.subf %241, %244 : vector<8x8xf32>
    %246 = math.exp %245 : vector<8x8xf32>
    %cst_79 = arith.constant dense<0.000000e+00> : vector<8xf32>
    %247 = vector.multi_reduction <add>, %246, %cst_79 [1] : vector<8x8xf32> to vector<8xf32>
    %248 = vector.shape_cast %247 : vector<8xf32> to vector<8x1xf32>
    %249 = vector.broadcast %248 : vector<8x1xf32> to vector<8x8xf32>
    %250 = arith.divf %246, %249 : vector<8x8xf32>
    %cst_80 = arith.constant dense<0.000000e+00> : vector<8x16xf32>
    %251 = tpu.matmul %250, %238, %cst_80 {dimension_numbers = #tpu.dot_dimension_numbers<[1], [0], [0], [1], [0, 0, 1, 1], [], []>} : vector<8x8xf32>, vector<8x16xf32>, vector<8x16xf32> -> vector<8x16xf32>
    %c0_81 = arith.constant 0 : index
    %c0_82 = arith.constant 0 : index
    %252 = vector.load %arg4[%c0_81, %c0_82] : memref<16x32xf32, #tpu.memory_space<vmem>>, vector<8x16xf32>
    tpu.vector_store %arg4[%c0_81, %c0_82], %251 {strides = array<i32>} : memref<16x32xf32, #tpu.memory_space<vmem>>, vector<8x16xf32>,
    %253 = vector.extract_strided_slice %234 {offsets = [0, 16], sizes = [8, 16], strides = [1, 1]} : vector<16x96xf32> to vector<8x16xf32>
    %254 = vector.extract_strided_slice %234 {offsets = [0, 48], sizes = [8, 16], strides = [1, 1]} : vector<16x96xf32> to vector<8x16xf32>
    %255 = vector.extract_strided_slice %234 {offsets = [0, 80], sizes = [8, 16], strides = [1, 1]} : vector<16x96xf32> to vector<8x16xf32>
    %cst_83 = arith.constant dense<0.000000e+00> : vector<8x8xf32>
    %256 = tpu.matmul %253, %254, %cst_83 {dimension_numbers = #tpu.dot_dimension_numbers<[1], [1], [0], [0], [0, 0, 1, 0], [], []>} : vector<8x16xf32>, vector<8x16xf32>, vector<8x8xf32> -> vector<8x8xf32>
    %257 = vector.broadcast %235 : vector<1x8xf32> to vector<8x8xf32>
    %258 = arith.addf %256, %257 : vector<8x8xf32>
    %cst_84 = arith.constant dense<0xFF800000> : vector<8xf32>
    %259 = vector.multi_reduction <maximumf>, %258, %cst_84 [1] : vector<8x8xf32> to vector<8xf32>
    %260 = vector.shape_cast %259 : vector<8xf32> to vector<8x1xf32>
    %261 = vector.broadcast %260 : vector<8x1xf32> to vector<8x8xf32>
    %262 = arith.subf %258, %261 : vector<8x8xf32>
    %263 = math.exp %262 : vector<8x8xf32>
    %cst_85 = arith.constant dense<0.000000e+00> : vector<8xf32>
    %264 = vector.multi_reduction <add>, %263, %cst_85 [1] : vector<8x8xf32> to vector<8xf32>
    %265 = vector.shape_cast %264 : vector<8xf32> to vector<8x1xf32>
    %266 = vector.broadcast %265 : vector<8x1xf32> to vector<8x8xf32>
    %267 = arith.divf %263, %266 : vector<8x8xf32>
    %cst_86 = arith.constant dense<0.000000e+00> : vector<8x16xf32>
    %268 = tpu.matmul %267, %255, %cst_86 {dimension_numbers = #tpu.dot_dimension_numbers<[1], [0], [0], [1], [0, 0, 1, 1], [], []>} : vector<8x8xf32>, vector<8x16xf32>, vector<8x16xf32> -> vector<8x16xf32>
    %c0_87 = arith.constant 0 : index
    %c16_88 = arith.constant 16 : index
    %269 = vector.load %arg4[%c0_87, %c16_88] : memref<16x32xf32, #tpu.memory_space<vmem>>, vector<8x16xf32>
    tpu.vector_store %arg4[%c0_87, %c16_88], %268 {strides = array<i32>} : memref<16x32xf32, #tpu.memory_space<vmem>>, vector<8x16xf32>,
    %270 = vector.extract_strided_slice %75 {offsets = [1, 0], sizes = [1, 8], strides = [1, 1]} : vector<2x8xf32> to vector<1x8xf32>
    %271 = vector.extract_strided_slice %234 {offsets = [8, 0], sizes = [8, 16], strides = [1, 1]} : vector<16x96xf32> to vector<8x16xf32>
    %272 = vector.extract_strided_slice %234 {offsets = [8, 32], sizes = [8, 16], strides = [1, 1]} : vector<16x96xf32> to vector<8x16xf32>
    %273 = vector.extract_strided_slice %234 {offsets = [8, 64], sizes = [8, 16], strides = [1, 1]} : vector<16x96xf32> to vector<8x16xf32>
    %cst_89 = arith.constant dense<0.000000e+00> : vector<8x8xf32>
    %274 = tpu.matmul %271, %272, %cst_89 {dimension_numbers = #tpu.dot_dimension_numbers<[1], [1], [0], [0], [0, 0, 1, 0], [], []>} : vector<8x16xf32>, vector<8x16xf32>, vector<8x8xf32> -> vector<8x8xf32>
    %275 = vector.broadcast %270 : vector<1x8xf32> to vector<8x8xf32>
    %276 = arith.addf %274, %275 : vector<8x8xf32>
    %cst_90 = arith.constant dense<0xFF800000> : vector<8xf32>
    %277 = vector.multi_reduction <maximumf>, %276, %cst_90 [1] : vector<8x8xf32> to vector<8xf32>
    %278 = vector.shape_cast %277 : vector<8xf32> to vector<8x1xf32>
    %279 = vector.broadcast %278 : vector<8x1xf32> to vector<8x8xf32>
    %280 = arith.subf %276, %279 : vector<8x8xf32>
    %281 = math.exp %280 : vector<8x8xf32>
    %cst_91 = arith.constant dense<0.000000e+00> : vector<8xf32>
    %282 = vector.multi_reduction <add>, %281, %cst_91 [1] : vector<8x8xf32> to vector<8xf32>
    %283 = vector.shape_cast %282 : vector<8xf32> to vector<8x1xf32>
    %284 = vector.broadcast %283 : vector<8x1xf32> to vector<8x8xf32>
    %285 = arith.divf %281, %284 : vector<8x8xf32>
    %cst_92 = arith.constant dense<0.000000e+00> : vector<8x16xf32>
    %286 = tpu.matmul %285, %273, %cst_92 {dimension_numbers = #tpu.dot_dimension_numbers<[1], [0], [0], [1], [0, 0, 1, 1], [], []>} : vector<8x8xf32>, vector<8x16xf32>, vector<8x16xf32> -> vector<8x16xf32>
    %c8_93 = arith.constant 8 : index
    %c0_94 = arith.constant 0 : index
    %287 = vector.load %arg4[%c8_93, %c0_94] : memref<16x32xf32, #tpu.memory_space<vmem>>, vector<8x16xf32>
    tpu.vector_store %arg4[%c8_93, %c0_94], %286 {strides = array<i32>} : memref<16x32xf32, #tpu.memory_space<vmem>>, vector<8x16xf32>,
    %288 = vector.extract_strided_slice %234 {offsets = [8, 16], sizes = [8, 16], strides = [1, 1]} : vector<16x96xf32> to vector<8x16xf32>
    %289 = vector.extract_strided_slice %234 {offsets = [8, 48], sizes = [8, 16], strides = [1, 1]} : vector<16x96xf32> to vector<8x16xf32>
    %290 = vector.extract_strided_slice %234 {offsets = [8, 80], sizes = [8, 16], strides = [1, 1]} : vector<16x96xf32> to vector<8x16xf32>
    %cst_95 = arith.constant dense<0.000000e+00> : vector<8x8xf32>
    %291 = tpu.matmul %288, %289, %cst_95 {dimension_numbers = #tpu.dot_dimension_numbers<[1], [1], [0], [0], [0, 0, 1, 0], [], []>} : vector<8x16xf32>, vector<8x16xf32>, vector<8x8xf32> -> vector<8x8xf32>
    %292 = vector.broadcast %270 : vector<1x8xf32> to vector<8x8xf32>
    %293 = arith.addf %291, %292 : vector<8x8xf32>
    %cst_96 = arith.constant dense<0xFF800000> : vector<8xf32>
    %294 = vector.multi_reduction <maximumf>, %293, %cst_96 [1] : vector<8x8xf32> to vector<8xf32>
    %295 = vector.shape_cast %294 : vector<8xf32> to vector<8x1xf32>
    %296 = vector.broadcast %295 : vector<8x1xf32> to vector<8x8xf32>
    %297 = arith.subf %293, %296 : vector<8x8xf32>
    %298 = math.exp %297 : vector<8x8xf32>
    %cst_97 = arith.constant dense<0.000000e+00> : vector<8xf32>
    %299 = vector.multi_reduction <add>, %298, %cst_97 [1] : vector<8x8xf32> to vector<8xf32>
    %300 = vector.shape_cast %299 : vector<8xf32> to vector<8x1xf32>
    %301 = vector.broadcast %300 : vector<8x1xf32> to vector<8x8xf32>
    %302 = arith.divf %298, %301 : vector<8x8xf32>
    %cst_98 = arith.constant dense<0.000000e+00> : vector<8x16xf32>
    %303 = tpu.matmul %302, %290, %cst_98 {dimension_numbers = #tpu.dot_dimension_numbers<[1], [0], [0], [1], [0, 0, 1, 1], [], []>} : vector<8x8xf32>, vector<8x16xf32>, vector<8x16xf32> -> vector<8x16xf32>
    %c8_99 = arith.constant 8 : index
    %c16_100 = arith.constant 16 : index
    %304 = vector.load %arg4[%c8_99, %c16_100] : memref<16x32xf32, #tpu.memory_space<vmem>>, vector<8x16xf32>
    tpu.vector_store %arg4[%c8_99, %c16_100], %303 {strides = array<i32>} : memref<16x32xf32, #tpu.memory_space<vmem>>, vector<8x16xf32>,
    %c0_101 = arith.constant 0 : index
    %c0_102 = arith.constant 0 : index
    %305 = vector.load %arg4[%c0_101, %c0_102] : memref<16x32xf32, #tpu.memory_space<vmem>>, vector<16x32xf32>
    %c448 = arith.constant 448 : index
    %c0_103 = arith.constant 0 : index
    %306 = vector.load %arg2[%c448, %c0_103] : memref<704x128xf32, #tpu.memory_space<vmem>>, vector<32x32xf32>
    %cst_104 = arith.constant dense<0.000000e+00> : vector<16x32xf32>
    %307 = tpu.matmul %305, %306, %cst_104 {dimension_numbers = #tpu.dot_dimension_numbers<[1], [0], [0], [1], [0, 0, 1, 1], [], []>} : vector<16x32xf32>, vector<32x32xf32>, vector<16x32xf32> -> vector<16x32xf32>
    %c480 = arith.constant 480 : index
    %c0_105 = arith.constant 0 : index
    %308 = vector.load %arg2[%c480, %c0_105] : memref<704x128xf32, #tpu.memory_space<vmem>>, vector<1x32xf32>
    %309 = vector.broadcast %308 : vector<1x32xf32> to vector<16x32xf32>
    %310 = arith.addf %307, %309 : vector<16x32xf32>
    %311 = arith.addf %310, %229 : vector<16x32xf32>
    %c488 = arith.constant 488 : index
    %c0_106 = arith.constant 0 : index
    %312 = vector.load %arg2[%c488, %c0_106] : memref<704x128xf32, #tpu.memory_space<vmem>>, vector<1x32xf32>
    %c496 = arith.constant 496 : index
    %c0_107 = arith.constant 0 : index
    %313 = vector.load %arg2[%c496, %c0_107] : memref<704x128xf32, #tpu.memory_space<vmem>>, vector<1x32xf32>
    %cst_108 = arith.constant dense<0.000000e+00> : vector<16xf32>
    %314 = vector.multi_reduction <add>, %311, %cst_108 [1] : vector<16x32xf32> to vector<16xf32>
    %315 = vector.shape_cast %314 : vector<16xf32> to vector<16x1xf32>
    %cst_109 = arith.constant 3.200000e+01 : f32
    %316 = vector.broadcast %cst_109 : f32 to vector<16x1xf32>
    %317 = arith.divf %315, %316 : vector<16x1xf32>
    %318 = vector.broadcast %317 : vector<16x1xf32> to vector<16x32xf32>
    %319 = arith.subf %311, %318 : vector<16x32xf32>
    %320 = arith.mulf %319, %319 : vector<16x32xf32>
    %cst_110 = arith.constant dense<0.000000e+00> : vector<16xf32>
    %321 = vector.multi_reduction <add>, %320, %cst_110 [1] : vector<16x32xf32> to vector<16xf32>
    %322 = vector.shape_cast %321 : vector<16xf32> to vector<16x1xf32>
    %cst_111 = arith.constant 3.200000e+01 : f32
    %323 = vector.broadcast %cst_111 : f32 to vector<16x1xf32>
    %324 = arith.divf %322, %323 : vector<16x1xf32>
    %325 = vector.broadcast %317 : vector<16x1xf32> to vector<16x32xf32>
    %326 = arith.subf %311, %325 : vector<16x32xf32>
    %cst_112 = arith.constant 9.99999996E-13 : f32
    %327 = vector.broadcast %cst_112 : f32 to vector<16x1xf32>
    %328 = arith.addf %324, %327 : vector<16x1xf32>
    %329 = math.rsqrt %328 : vector<16x1xf32>
    %330 = vector.broadcast %329 : vector<16x1xf32> to vector<16x32xf32>
    %331 = arith.mulf %326, %330 : vector<16x32xf32>
    %332 = vector.broadcast %312 : vector<1x32xf32> to vector<16x32xf32>
    %333 = arith.mulf %331, %332 : vector<16x32xf32>
    %334 = vector.broadcast %313 : vector<1x32xf32> to vector<16x32xf32>
    %335 = arith.addf %333, %334 : vector<16x32xf32>
    %c504 = arith.constant 504 : index
    %c0_113 = arith.constant 0 : index
    %336 = vector.load %arg2[%c504, %c0_113] : memref<704x128xf32, #tpu.memory_space<vmem>>, vector<32x64xf32>
    %cst_114 = arith.constant dense<0.000000e+00> : vector<16x64xf32>
    %337 = tpu.matmul %335, %336, %cst_114 {dimension_numbers = #tpu.dot_dimension_numbers<[1], [0], [0], [1], [0, 0, 1, 1], [], []>} : vector<16x32xf32>, vector<32x64xf32>, vector<16x64xf32> -> vector<16x64xf32>
    %c536 = arith.constant 536 : index
    %c0_115 = arith.constant 0 : index
    %338 = vector.load %arg2[%c536, %c0_115] : memref<704x128xf32, #tpu.memory_space<vmem>>, vector<1x64xf32>
    %339 = vector.broadcast %338 : vector<1x64xf32> to vector<16x64xf32>
    %340 = arith.addf %337, %339 : vector<16x64xf32>
    %cst_116 = arith.constant 5.000000e-01 : f32
    %341 = vector.broadcast %cst_116 : f32 to vector<16x64xf32>
    %342 = arith.mulf %341, %340 : vector<16x64xf32>
    %cst_117 = arith.constant 4.471500e-02 : f32
    %343 = vector.broadcast %cst_117 : f32 to vector<16x64xf32>
    %344 = arith.mulf %343, %340 : vector<16x64xf32>
    %345 = arith.mulf %344, %340 : vector<16x64xf32>
    %346 = arith.mulf %345, %340 : vector<16x64xf32>
    %347 = arith.addf %340, %346 : vector<16x64xf32>
    %cst_118 = arith.constant 0.797884583 : f32
    %348 = vector.broadcast %cst_118 : f32 to vector<16x64xf32>
    %349 = arith.mulf %348, %347 : vector<16x64xf32>
    %350 = math.tanh %349 : vector<16x64xf32>
    %cst_119 = arith.constant 1.000000e+00 : f32
    %351 = vector.broadcast %cst_119 : f32 to vector<16x64xf32>
    %352 = arith.addf %351, %350 : vector<16x64xf32>
    %353 = arith.mulf %342, %352 : vector<16x64xf32>
    %c544 = arith.constant 544 : index
    %c0_120 = arith.constant 0 : index
    %354 = vector.load %arg2[%c544, %c0_120] : memref<704x128xf32, #tpu.memory_space<vmem>>, vector<64x32xf32>
    %cst_121 = arith.constant dense<0.000000e+00> : vector<16x32xf32>
    %355 = tpu.matmul %353, %354, %cst_121 {dimension_numbers = #tpu.dot_dimension_numbers<[1], [0], [0], [1], [0, 0, 1, 1], [], []>} : vector<16x64xf32>, vector<64x32xf32>, vector<16x32xf32> -> vector<16x32xf32>
    %c608 = arith.constant 608 : index
    %c0_122 = arith.constant 0 : index
    %356 = vector.load %arg2[%c608, %c0_122] : memref<704x128xf32, #tpu.memory_space<vmem>>, vector<1x32xf32>
    %357 = vector.broadcast %356 : vector<1x32xf32> to vector<16x32xf32>
    %358 = arith.addf %355, %357 : vector<16x32xf32>
    %359 = arith.addf %358, %335 : vector<16x32xf32>
    %c616 = arith.constant 616 : index
    %c0_123 = arith.constant 0 : index
    %360 = vector.load %arg2[%c616, %c0_123] : memref<704x128xf32, #tpu.memory_space<vmem>>, vector<1x32xf32>
    %c624 = arith.constant 624 : index
    %c0_124 = arith.constant 0 : index
    %361 = vector.load %arg2[%c624, %c0_124] : memref<704x128xf32, #tpu.memory_space<vmem>>, vector<1x32xf32>
    %cst_125 = arith.constant dense<0.000000e+00> : vector<16xf32>
    %362 = vector.multi_reduction <add>, %359, %cst_125 [1] : vector<16x32xf32> to vector<16xf32>
    %363 = vector.shape_cast %362 : vector<16xf32> to vector<16x1xf32>
    %cst_126 = arith.constant 3.200000e+01 : f32
    %364 = vector.broadcast %cst_126 : f32 to vector<16x1xf32>
    %365 = arith.divf %363, %364 : vector<16x1xf32>
    %366 = vector.broadcast %365 : vector<16x1xf32> to vector<16x32xf32>
    %367 = arith.subf %359, %366 : vector<16x32xf32>
    %368 = arith.mulf %367, %367 : vector<16x32xf32>
    %cst_127 = arith.constant dense<0.000000e+00> : vector<16xf32>
    %369 = vector.multi_reduction <add>, %368, %cst_127 [1] : vector<16x32xf32> to vector<16xf32>
    %370 = vector.shape_cast %369 : vector<16xf32> to vector<16x1xf32>
    %cst_128 = arith.constant 3.200000e+01 : f32
    %371 = vector.broadcast %cst_128 : f32 to vector<16x1xf32>
    %372 = arith.divf %370, %371 : vector<16x1xf32>
    %373 = vector.broadcast %365 : vector<16x1xf32> to vector<16x32xf32>
    %374 = arith.subf %359, %373 : vector<16x32xf32>
    %cst_129 = arith.constant 9.99999996E-13 : f32
    %375 = vector.broadcast %cst_129 : f32 to vector<16x1xf32>
    %376 = arith.addf %372, %375 : vector<16x1xf32>
    %377 = math.rsqrt %376 : vector<16x1xf32>
    %378 = vector.broadcast %377 : vector<16x1xf32> to vector<16x32xf32>
    %379 = arith.mulf %374, %378 : vector<16x32xf32>
    %380 = vector.broadcast %360 : vector<1x32xf32> to vector<16x32xf32>
    %381 = arith.mulf %379, %380 : vector<16x32xf32>
    %382 = vector.broadcast %361 : vector<1x32xf32> to vector<16x32xf32>
    %383 = arith.addf %381, %382 : vector<16x32xf32>
    %c632 = arith.constant 632 : index
    %c0_130 = arith.constant 0 : index
    %384 = vector.load %arg2[%c632, %c0_130] : memref<704x128xf32, #tpu.memory_space<vmem>>, vector<32x3xf32>
    %c664 = arith.constant 664 : index
    %c0_131 = arith.constant 0 : index
    %385 = vector.load %arg2[%c664, %c0_131] : memref<704x128xf32, #tpu.memory_space<vmem>>, vector<32x3xf32>
    %cst_132 = arith.constant dense<0.000000e+00> : vector<16x3xf32>
    %386 = tpu.matmul %383, %384, %cst_132 {dimension_numbers = #tpu.dot_dimension_numbers<[1], [0], [0], [1], [0, 0, 1, 1], [], []>} : vector<16x32xf32>, vector<32x3xf32>, vector<16x3xf32> -> vector<16x3xf32>
    %cst_133 = arith.constant dense<0.000000e+00> : vector<16x3xf32>
    %387 = tpu.matmul %229, %385, %cst_133 {dimension_numbers = #tpu.dot_dimension_numbers<[1], [0], [0], [1], [0, 0, 1, 1], [], []>} : vector<16x32xf32>, vector<32x3xf32>, vector<16x3xf32> -> vector<16x3xf32>
    %388 = arith.addf %386, %387 : vector<16x3xf32>
    %c696 = arith.constant 696 : index
    %c0_134 = arith.constant 0 : index
    %389 = vector.load %arg2[%c696, %c0_134] : memref<704x128xf32, #tpu.memory_space<vmem>>, vector<1x3xf32>
    %390 = vector.broadcast %389 : vector<1x3xf32> to vector<16x3xf32>
    %391 = arith.addf %388, %390 : vector<16x3xf32>
    %392 = tpu.iota {dimensions = array<i32: 1>} : vector<16x3xi32>
    %c0_i32 = arith.constant 0 : i32
    %393 = vector.broadcast %c0_i32 : i32 to vector<16x3xi32>
    %394 = arith.cmpi eq, %392, %393 : vector<16x3xi32>
    %c0_i32_135 = arith.constant 0 : i32
    %395 = vector.broadcast %c0_i32_135 : i32 to vector<16x1xi32>
    %396 = arith.cmpi ne, %3, %395 : vector<16x1xi32>
    %397 = vector.broadcast %396 : vector<16x1xi1> to vector<16x3xi1>
    %398 = arith.andi %394, %397 : vector<16x3xi1>
    %c1_i32_136 = arith.constant 1 : i32
    %399 = vector.broadcast %c1_i32_136 : i32 to vector<16x3xi32>
    %400 = arith.cmpi eq, %392, %399 : vector<16x3xi32>
    %c0_i32_137 = arith.constant 0 : i32
    %401 = vector.broadcast %c0_i32_137 : i32 to vector<16x1xi32>
    %402 = arith.cmpi ne, %4, %401 : vector<16x1xi32>
    %403 = vector.broadcast %402 : vector<16x1xi1> to vector<16x3xi1>
    %404 = arith.andi %400, %403 : vector<16x3xi1>
    %405 = arith.ori %398, %404 : vector<16x3xi1>
    %cst_138 = arith.constant 0xFF800000 : f32
    %406 = vector.broadcast %cst_138 : f32 to vector<16x3xf32>
    %407 = arith.select %405, %406, %391 : vector<16x3xi1>, vector<16x3xf32>
    %c0_139 = arith.constant 0 : index
    %c0_140 = arith.constant 0 : index
    %408 = vector.load %arg3[%c0_139, %c0_140] : memref<16x3xf32, #tpu.memory_space<vmem>>, vector<16x3xf32>
    tpu.vector_store %arg3[%c0_139, %c0_140], %407 {strides = array<i32>} : memref<16x3xf32, #tpu.memory_space<vmem>>, vector<16x3xf32>,
    return
  }
}

</mosaic_0001>

<bundles_post_ra>
// kernel: model_forward.1
= control target key start
LH: loop header
LB: loop body
LE: loop exit
PB: predicated region body
PF: predicated region fallthrough
CT: control target
= control target key end

     0   :  { %8 = vsyncpa [#allocation4], 0  ;;  %s3347_s12 = smov [#allocation3]   ;;  %s3721_s0 = inlined_call_operand.vmem [shape: s32[16,4], index: 0, kind: input, shape index: {}]   ;;  %s3722_s1 = inlined_call_operand.vmem [shape: f32[2,8], index: 1, kind: input, shape index: {}]   ;;  %s3723_s2 = inlined_call_operand.hbm [shape: f32[704,128], index: 2, kind: input, shape index: {}]   ;;  %s3724_s3 = inlined_call_operand.vmem [shape: f32[16,3], index: 3, kind: output, shape index: {}]  }
   0x1   :  { %s18_s13 = sshll.u32 %s3347_s12, 4  ;;  %s19_s13 = int_to_ptr.vmem [resolvable:$true] %s18_s13 }
   0x2   :  { %s3333_s14 = scalar_lea.vmem %s19_s13, 11264  ;;  %p3338_p1 = scmp.lt.s32.totalorder %s19_s13, %s19_s13 }
   0x3   :  { %p3334_p0 = scmp.ne.s32.totalorder %s19_s13, %s3333_s14  ;;  %p3339_p2 = scmp.lt.s32.totalorder %s3333_s14, %s3333_s14 }
   0x5   :  { %p3340_p3 = por %p3339_p2, %p3338_p1 }
   0x7   :  { %p3341_p4 = pnand %p3340_p3, %p3334_p0 }
   0x9   :  { %3344 = shalt.err (!%p3341_p4)
}
   0xa   :  { %s3348_s15 = smov 128   ;;  %s3349_s16 = smov 8  }
   0xb   :  { %24 = dma.hbm_to_vmem [thread:$0]  %s3723_s2, 11264, %s19_s13, [#allocation4], %s3348_s15, %s3348_s15, %s3349_s16  }
   0xc   :  { %3345 = dma.done.wait [#allocation4], 11264  }
   0xd   :  { %3346 = vsyncadd [#allocation4], 4294956032  ;;  %v36_v0 = vlaneseq  ;;  %v3350_v1 = vmov 0.0   ;;  %v3397_v10 = vld [vmem:[%s3721_s0 + $0x8] sm:$0xff]  ;;  %v3402_v11 = vld [vmem:[%s3721_s0] sm:$0xff]  ;;  %v3351_v14 = vmov 1.0  }
   0xe   :  { %225 = vmatprep.subr.mxu1 %v3350_v1  ;;  %vm31_vm1 = vcmp.ne.s32.totalorder %v3397_v10, 1  ;;  %vm30_vm2 = vcmp.ne.s32.totalorder %v3402_v11, 1  ;;  %vm3725_vm4 = vcmask 130048   ;;  %v3352_v19 = vmov 0   ;;  %v212_v23 = vld [vmem:[#allocation3 + $0x78] sm:$0xff]  ;;  %v211_v24 = vld [vmem:[#allocation3 + $0x70] sm:$0xff] }
   0xf   :  { %v3387_v2 = vshrl.u32 %v36_v0, 7  ;;  %v3389_v3 = vand.u32 127, %v36_v0  ;;  %3023 = vmatprep.subr.msk.mxu0 %vm31_vm1, %v3351_v14  ;;  %3257 = vset.pattern.permute.xlu1 %v3352_v19  ;;  %v173_v20 = vadd.s32 164, %v3402_v11  ;;  %v3353_v21 = vmov 1   ;;  %v210_v25 = vld [vmem:[#allocation3 + $0x68] sm:$0xff]  ;;  %v209_v26 = vld [vmem:[#allocation3 + $0x60] sm:$0xff] }
  0x10   :  { %3024 = vmatpush3.msk.msra.mxu0 %vm31_vm1, %v3351_v14  ;;  %3256 = vset.pattern.permute.xlu0 %v3352_v19  ;;  %v174_v22 = vadd.s32 164, %v3397_v10  ;;  %v208_v27 = vld [vmem:[#allocation3 + $0x58] sm:$0xff]  ;;  %v207_v28 = vld [vmem:[#allocation3 + $0x50] sm:$0xff]  ;;  %v206_v29 = vld [vmem:[#allocation3 + $0x48] sm:$0xff]  ;;  %v2842_v41 = vsel %vm31_vm1, 1.0, %v3350_v1  ;;  %v2841_v43 = vsel %vm30_vm2, 1.0, %v3350_v1 }
  0x11   :  { %v41_v4 = vcvt.s32.f32 %v3387_v2  ;;  %v47_v5 = vcvt.s32.f32 %v3389_v3  ;;  %v38_v6 = vadd.s32 8, %v3387_v2  ;;  %vm52_vm0 = vcmp.le.s32.totalorder %v3389_v3, %v3387_v2  ;;  %3025 = vmatprep.subr.msk.mxu0 %vm30_vm2, %v3351_v14  ;;  %151 = vperm.xlu1 %3257, %v3397_v10   ;;  %v205_v30 = vld [vmem:[#allocation3 + $0x40] sm:$0xff]  ;;  %v204_v31 = vld [vmem:[#allocation3 + $0x38] sm:$0xff]  ;;  %v203_v32 = vld [vmem:[#allocation3 + $0x30] sm:$0xff]  ;;  %s3355_s22 = smov 96   ;;  %s3356_s23 = smov 80  }
  0x12   :  { %3026 = vmatpush3.msk.msra.mxu0 %vm30_vm2, %v3351_v14  ;;  %148 = vperm.xlu0 %3256, %v3402_v11   ;;  %v202_v33 = vld [vmem:[#allocation3 + $0x28] sm:$0xff]  ;;  %v201_v34 = vld [vmem:[#allocation3 + $0x20] sm:$0xff]  ;;  %v200_v35 = vld [vmem:[#allocation3 + $0x18] sm:$0xff]  ;;  %v146_v60 = vadd.s32 128, %v3389_v3  ;;  %vm218_vm1 = vcmask 326656   ;;  %s3357_s24 = smov 112  }
  0x13   :  { %v43_v7 = vmul.f32 0.125, %v41_v4  ;;  %v48_v8 = vmul.f32 0.125, %v47_v5  ;;  %v42_v9 = vcvt.s32.f32 %v38_v6  ;;  %vm53_vm6 = vcmp.le.s32.totalorder %v3389_v3, %v38_v6  ;;  %226 = vmatpush1.msra.mxu1 %v212_v23  ;;  %v199_v36 = vld [vmem:[#allocation3 + $0x10] sm:$0xff]  ;;  %v198_v37 = vld [vmem:[#allocation3 + $0x8] sm:$0xff]  ;;  %v197_v38 = vld [vmem:[#allocation3] sm:$0xff]  ;;  %s3359_s27 = smov 48  }
  0x14   :  { %227 = vmatprep.subr.mxu1 %v3350_v1  ;;  %v217_v39 = vld [vmem:[#allocation3 + $0xa0] sm:$0xff]  ;;  %v216_v40 = vld [vmem:[#allocation3 + $0x98] sm:$0xff]  ;;  %v215_v51 = vld [vmem:[#allocation3 + $0x90] sm:$0xff]  ;;  %s3360_s28 = smov 16  }
  0x15   :  { %v45_v12 = vfloor.f32 %v43_v7  ;;  %v49_v13 = vfloor.f32 %v48_v8  ;;  %v44_v15 = vmul.f32 0.125, %v42_v9  ;;  %3258 = vset.pattern.permute.xlu1 %v3353_v21  ;;  %228 = vmatpush1.msra.mxu1 %v211_v24  ;;  %v214_v53 = vld [vmem:[#allocation3 + $0x88] sm:$0xff]  ;;  %v213_v56 = vld [vmem:[#allocation3 + $0x80] sm:$0xff]  ;;  %v348_v23 = vld [vmem:[#allocation3 + $0xd0] sm:$0xff] }
  0x16   :  { %176 = vperm.xlu1 %3258, %v173_v20   ;;  %229 = vmatprep.subr.mxu1 %v3350_v1  ;;  %v347_v24 = vld [vmem:[#allocation3 + $0xc8] sm:$0xff] }
  0x17   :  { %vm50_vm3 = vcmp.eq.f32.partialorder %v45_v12, %v49_v13  ;;  %v46_v16 = vfloor.f32 %v44_v15  ;;  %230 = vmatpush1.msra.mxu1 %v210_v25  ;;  %3030 = vmatprep.subr.mxu0 %v348_v23  ;;  %v346_v25 = vld [vmem:[#allocation3 + $0xc0] sm:$0xff] }
  0x18   :  { %vm54_vm5 = vmand %vm50_vm3, %vm52_vm0  ;;  %231 = vmatprep.subr.mxu1 %v3350_v1 }
  0x19   :  { %v56_v17 = vsel %vm54_vm5, 1.0, %v3350_v1  ;;  %vm51_vm7 = vcmp.eq.f32.partialorder %v46_v16, %v49_v13  ;;  %232 = vmatpush1.msra.mxu1 %v209_v26  ;;  %v345_v26 = vld [vmem:[#allocation3 + $0xb8] sm:$0xff] }
  0x1a   :  { %3027 = vmatprep.mubr.msk.f32.mxu0 %vm3725_vm4, %v56_v17  ;;  %vm55_vm8 = vmand %vm51_vm7, %vm53_vm6  ;;  %179 = vperm.xlu1 %3258, %v174_v22  }
  0x1b   :  { %v57_v18 = vsel %vm55_vm8, 1.0, %v3350_v1  ;;  %233 = vmatprep.subr.mxu1 %v3350_v1 }
  0x1c   :  { %3028 = vmatmul.mubr.msk.f32.vlgmr.msra.gmra.mxu0 %vm3725_vm4, %v57_v18  ;;  %234 = vmatpush1.msra.mxu1 %v208_v27 }
  0x1d   :  { %235 = vmatprep.subr.mxu1 %v3350_v1  ;;  %3031 = vmatpush3.msra.mxu0 %v348_v23 }
  0x1e   :  { %236 = vmatpush1.msra.mxu1 %v207_v28  ;;  %3032 = vmatprep.subr.mxu0 %v347_v24 }
  0x1f   :  { %237 = vmatprep.subr.mxu1 %v3350_v1  ;;  %3033 = vmatpush3.msra.mxu0 %v347_v24 }
  0x20   :  { %238 = vmatpush1.msra.mxu1 %v206_v29  ;;  %3034 = vmatprep.subr.mxu0 %v346_v25 }
  0x21   :  { %239 = vmatprep.subr.mxu1 %v3350_v1  ;;  %3035 = vmatpush3.msra.mxu0 %v346_v25  ;;  %v778_v25 = vsub.s32 1, %v3387_v2 }
  0x22   :  { %240 = vmatpush1.msra.mxu1 %v205_v30  ;;  %3036 = vmatprep.subr.mxu0 %v345_v26 }
  0x23   :  { %241 = vmatprep.subr.mxu1 %v3350_v1  ;;  %3037 = vmatpush3.msra.mxu0 %v345_v26 }
  0x24   :  { %242 = vmatpush1.msra.mxu1 %v204_v31  ;;  %3041 = vmatprep.subr.mxu0 %v3350_v1 }
  0x25   :  { %243 = vmatprep.subr.mxu1 %v3350_v1 }
  0x26   :  { %244 = vmatpush1.msra.mxu1 %v203_v32 }
  0x27   :  { %245 = vmatprep.subr.mxu1 %v3350_v1 }
  0x28   :  { %246 = vmatpush1.msra.mxu1 %v202_v33 }
  0x29   :  { %247 = vmatprep.subr.mxu1 %v3350_v1 }
  0x2a   :  { %248 = vmatpush1.msra.mxu1 %v201_v34  ;;  %v2855_v34 = vld [vmem:[#allocation3 + $0xa8] ss:$0 sm:$0xff] }
  0x2b   :  { %249 = vmatprep.subr.mxu1 %v3350_v1 }
  0x2c   :  { %250 = vmatpush1.msra.mxu1 %v200_v35 }
  0x2d   :  { %251 = vmatprep.subr.mxu1 %v3350_v1 }
  0x2e   :  { %252 = vmatpush1.msra.mxu1 %v199_v36  ;;  %v2856_v36 = vld [vmem:[#allocation3 + $0xb0] ss:$0 sm:$0xff] }
  0x2f   :  { %253 = vmatprep.subr.mxu1 %v3350_v1 }
  0x30   :  { %254 = vmatpush1.msra.mxu1 %v198_v37 }
  0x31   :  { %255 = vmatprep.subr.mxu1 %v3350_v1 }
  0x32   :  { %256 = vmatpush1.msra.mxu1 %v197_v38 }
  0x33   :  { %279 = vmatprep.subr.mxu1 %v3350_v1 }
  0x34   :  { %280 = vmatpush2.msra.mxu1 %v217_v39 }
  0x35   :  { %281 = vmatprep.subr.mxu1 %v3350_v1 }
  0x36   :  { %282 = vmatpush2.msra.mxu1 %v216_v40 }
  0x37   :  { %283 = vmatprep.subr.mxu1 %v3350_v1 }
  0x38   :  { %284 = vmatpush2.msra.mxu1 %v215_v51 }
  0x39   :  { %285 = vmatprep.subr.mxu1 %v3350_v1 }
  0x3a   :  { %286 = vmatpush2.msra.mxu1 %v214_v53 }
  0x3b   :  { %287 = vmatprep.subr.mxu1 %v3350_v1 }
  0x3c   :  { %288 = vmatpush2.msra.mxu1 %v213_v56 }
  0x8c   :  { %v152_v58 = vpop.permute.xlu1 %151 }
  0x8d   :  { %v149_v59 = vpop.permute.xlu0 %148  ;;  %vm155_vm3 = vcmp.eq.s32.totalorder %v3389_v3, %v152_v58  ;;  %vm156_vm8 = vcmp.eq.s32.totalorder %v146_v60, %v152_v58 }
  0x8e   :  { %vm153_vm9 = vcmp.eq.s32.totalorder %v3389_v3, %v149_v59  ;;  %vm154_vm13 = vcmp.eq.s32.totalorder %v146_v60, %v149_v59 }
  0x91   :  { %v177_v61 = vpop.permute.xlu1 %176 }
  0x92   :  { %vm182_vm10 = vcmp.eq.s32.totalorder %v146_v60, %v177_v61  ;;  %vm181_vm14 = vcmp.eq.s32.totalorder %v3389_v3, %v177_v61 }
  0x95   :  { %v180_v63 = vpop.permute.xlu1 %179 }
  0xdc   :  { %v3029_v42 = vpop.f32.mrf.mxu0 }
  0xdd   :  { %v141_v44 = vmul.f32 %v3029_v42, %v2842_v41 }
  0xde   :  { %v131_v45 = vpop.f32.mrf.mxu0 }
  0xdf   :  { %v3238_v46 = vtrunc.f32 %v141_v44  ;;  %v140_v47 = vmul.f32 %v2841_v43, %v131_v45  ;;  %v2858_v43 = vld [vmem:[#allocation3 + $0xd8] ss:$0 sm:$0xff] }
  0xe1   :  { %v3236_v48 = vtrunc.f32 %v140_v47  ;;  %v3239_v49 = vcvt.f32.s32 %v3238_v46 }
  0xe3   :  { %v3237_v50 = vcvt.f32.s32 %v3236_v48  ;;  %v145_v54 = vadd.s32 1, %v3239_v49  ;;  %v342_v49 = vld [vmem:[%s3722_s1] sm:$0x3]  ;;  %s3358_s1 = smov 64  }
  0xe5   :  { %v144_v52 = vadd.s32 1, %v3237_v50  ;;  %v158_v57 = vadd.s32 100, %v145_v54  ;;  %v2857_v50 = vadd.f32 -1.0, %v342_v49 }
  0xe7   :  { %v157_v55 = vadd.s32 100, %v144_v52  ;;  %v3498_v51 = vmul.f32 1e+09, %v2857_v50  ;;  %v437_v52 = vsub.s32 0, %v3387_v2 }
  0xe9   :  { %160 = vperm.xlu0 %3256, %v157_v55   ;;  %v3502_v53 = vrot.slane %v3498_v51, %v437_v52 }
  0xed   :  { %163 = vperm.xlu0 %3256, %v158_v57  }
 0x164   :  { %v161_v62 = vpop.permute.xlu0 %160 }
 0x165   :  { %vm165_vm11 = vcmp.eq.s32.totalorder %v3389_v3, %v161_v62  ;;  %vm166_vm12 = vcmp.eq.s32.totalorder %v146_v60, %v161_v62 }
 0x166   :  { %vm169_vm15 = vmor %vm153_vm9, %vm165_vm11  ;;  %vm184_vm9 = vcmp.eq.s32.totalorder %v146_v60, %v180_v63 }
 0x167   :  { %vm170_vm0 = vmor %vm154_vm13, %vm166_vm12  ;;  %vm183_vm13 = vcmp.eq.s32.totalorder %v3389_v3, %v180_v63 }
 0x168   :  { %v164_v0 = vpop.permute.xlu0 %163  ;;  %vm186_vm2 = vmor %vm170_vm0, %vm182_vm10  ;;  %vm302_vm0 = vcmask 261120  }
 0x169   :  { %vm167_vm5 = vcmp.eq.s32.totalorder %v3389_v3, %v164_v0  ;;  %vm168_vm6 = vcmp.eq.s32.totalorder %v146_v60, %v164_v0  ;;  %v2848_v4 = vsel %vm186_vm2, 1.0, %v3350_v1  ;;  %vm185_vm7 = vmor %vm169_vm15, %vm181_vm14  ;;  %vm3726_vm14 = vcmask 130048  }
 0x16a   :  { %vm171_vm4 = vmor %vm155_vm3, %vm167_vm5  ;;  %2851 = vmatprep.mubr.msk.f32.mxu1 %vm218_vm1, %v2848_v4 }
 0x16b   :  { %vm172_vm11 = vmor %vm156_vm8, %vm168_vm6  ;;  %2852 = vmatmul.mubr.msk.f32.vlgmr.msra.gmra.mxu1 %vm185_vm7, %v3351_v14 }
 0x16c   :  { %vm188_vm12 = vmor %vm172_vm11, %vm184_vm9 }
 0x16d   :  { %v2850_v5 = vsel %vm188_vm12, 1.0, %v3350_v1  ;;  %vm187_vm10 = vmor %vm171_vm4, %vm183_vm13  ;;  %vm3354_vm4 = vmmov 0   ;;  %vm774_vm12 = vcmask 261248   ;;  %vm1370_vm13 = vcmask 523264  }
 0x16e   :  { %2853 = vmatprep.mubr.msk.f32.mxu1 %vm218_vm1, %v2850_v5  ;;  %vm3727_vm15 = vmmov %vm3726_vm14  ;;  %vm516_vm1 = vcmask 64512  }
 0x16f   :  { %2854 = vmatmul.mubr.msk.f32.gmra.mxu1 %vm187_vm10, %v3351_v14  ;;  %vm3728_vm2 = vmmov %vm3726_vm14 }
 0x170   :  { %vm3729_vm3 = vmmov %vm3728_vm2 }
 0x171   :  { %vm3730_vm5 = vmmov %vm3728_vm2 }
 0x172   :  { %vm3731_vm6 = vmmov %vm3728_vm2 }
 0x173   :  { %vm3732_vm7 = vmmov %vm3728_vm2 }
 0x174   :  { %vm3733_vm8 = vmmov %vm3728_vm2 }
 0x175   :  { %vm3734_vm9 = vmmov %vm3728_vm2 }
 0x176   :  { %vm3735_vm11 = vmmov %vm3728_vm2 }
 0x177   :  { %vm3736_vm10 = vmmov %vm3728_vm2 }
 0x22b   :  { %v291_v6 = vpop.f32.mrf.mxu1 }
 0x22c   :  { %v303_v7 = vsel %vm302_vm0, %v291_v6, 0.0 }
 0x22d   :  { %304 = vadd.xlane.f32.xlu0 %v303_v7  ;;  %v293_v8 = vpop.f32.mrf.mxu1 }
 0x22f   :  { %v296_v9 = vpop.f32.mrf.mxu1 }
 0x230   :  { %v306_v10 = vsel %vm302_vm0, %v296_v9, 0.0 }
 0x231   :  { %307 = vadd.xlane.f32.xlu1 %v306_v10  ;;  %v298_v11 = vpop.f32.mrf.mxu1 }
 0x2b6   :  { %v305_v12 = vpop.xlane.xlu0 %304 }
 0x2b7   :  { %v310_v13 = vmul.f32 0.03125, %v305_v12 }
 0x2b9   :  { %v312_v15 = vsub.f32 %v291_v6, %v310_v13 }
 0x2ba   :  { %v308_v16 = vpop.xlane.xlu1 %307 }
 0x2bb   :  { %v311_v17 = vmul.f32 0.03125, %v308_v16  ;;  %v314_v18 = vmul.f32 %v312_v15, %v312_v15 }
 0x2bd   :  { %v313_v20 = vsub.f32 %v296_v9, %v311_v17  ;;  %v316_v14 = vsel %vm302_vm0, %v314_v18, 0.0 }
 0x2be   :  { %317 = vadd.xlane.f32.xlu0 %v316_v14 }
 0x2bf   :  { %v315_v21 = vmul.f32 %v313_v20, %v313_v20 }
 0x2c1   :  { %v319_v22 = vsel %vm302_vm0, %v315_v21, 0.0 }
 0x2c2   :  { %320 = vadd.xlane.f32.xlu0 %v319_v22 }
 0x347   :  { %v318_v27 = vpop.xlane.xlu0 %317 }
 0x348   :  { %v322_v28 = vmul.f32 0.03125, %v318_v27  ;;  %v3536_v27 = vrot.slane %v3498_v51, %v778_v25 }
 0x34a   :  { %v324_v29 = vadd.f32 1e-12, %v322_v28 }
 0x34b   :  { %v321_v30 = vpop.xlane.xlu0 %320 }
 0x34c   :  { %3263 = vrsqrt.f32 %v324_v29  ;;  %v323_v31 = vmul.f32 0.03125, %v321_v30 }
 0x34e   :  { %v325_v32 = vadd.f32 1e-12, %v323_v31 }
 0x350   :  { %3265 = vrsqrt.f32 %v325_v32 }
 0x359   :  { %v3264_v33 = vpop.eup %3263 }
 0x35a   :  { %v328_v35 = vmul.f32 %v3264_v33, %v312_v15 }
 0x35c   :  { %v334_v37 = vmul.f32 %v2855_v34, %v328_v35 }
 0x35d   :  { %v3266_v38 = vpop.eup %3265 }
 0x35e   :  { %v329_v39 = vmul.f32 %v3266_v38, %v313_v20  ;;  %v3475_v40 = vadd.f32 %v2856_v36, %v334_v37 }
 0x360   :  { %v335_v41 = vmul.f32 %v2855_v34, %v329_v39  ;;  %3038 = vmatprep.mubr.msk.f32.mxu0 %vm302_vm0, %v3475_v40 }
 0x362   :  { %v3479_v42 = vadd.f32 %v2856_v36, %v335_v41 }
 0x364   :  { %3039 = vmatmul.mubr.msk.f32.vlgmr.msra.gmra.mxu0 %vm302_vm0, %v3479_v42 }
 0x365   :  { %3043 = vmatprep.mubr.msk.f32.mxu0 %vm3354_vm4, %v3350_v1 }
 0x424   :  { %v3040_v44 = vpop.f32.mrf.mxu0 }
 0x425   :  { %v3485_v45 = vadd.f32 %v3040_v44, %v2858_v43 }
 0x426   :  { %v426_v46 = vpop.f32.mrf.mxu0 }
 0x427   :  { %v427_v47 = vadd.f32 %v2858_v43, %v426_v46 }
 0x429   :  { %440 = vrot.lane.b32.xlu1 %v427_v47, %s3355_s22 }
 0x42d   :  { %607 = vrot.lane.b32.xlu1 %v427_v47, %s3356_s23 }
 0x431   :  { %605 = vrot.lane.b32.xlu1 %v427_v47, %s3357_s24 }
 0x49b   :  { %v441_v48 = vpop.permute.xlu1 %440 }
 0x49c   :  { %3042 = vmatpush3.xpose.msk.msra.mxu0 %vm3726_vm14, %v441_v48  ;;  %vm3737_vm14 = vmmov %vm3728_vm2 }
 0x49d   :  { %3046 = vmatprep.subr.mxu0 %v3350_v1 }
 0x49f   :  { %3044 = vmatmul.mubr.msk.f32.vlgmr.msra.gmra.mxu0 %vm3727_vm15, %v427_v47  ;;  %v608_v5 = vpop.permute.xlu1 %607  ;;  %vm3738_vm15 = vmmov %vm3728_vm2 }
 0x4a0   :  { %3048 = vmatprep.mubr.msk.f32.mxu0 %vm3354_vm4, %v3350_v1 }
 0x4a3   :  { %v606_v7 = vpop.permute.xlu1 %605 }
 0x55f   :  { %v512_v54 = vpop.f32.mrf.mxu0 }
 0x560   :  { %v513_v55 = vadd.f32 %v512_v54, %v3502_v53 }
 0x561   :  { %v3045_v56 = vpop.f32.mrf.mxu0 }
 0x562   :  { %v517_v57 = vsel %vm516_vm1, %v513_v55, -inf }
 0x563   :  { %518 = vmax.xlane.f32.xlu0 %v517_v57 }
 0x5ec   :  { %v519_v58 = vpop.xlane.xlu0 %518 }
 0x5ed   :  { %v520_v59 = vsub.f32 %v513_v55, %v519_v58 }
 0x5ef   :  { %v521_v60 = vmul.f32 1.442695, %v520_v59 }
 0x5f1   :  { %3267 = vpow2.f32 %v521_v60 }
 0x5fe   :  { %v3268_v61 = vpop.eup %3267 }
 0x5ff   :  { %v523_v62 = vsel %vm516_vm1, %v3268_v61, 0.0 }
 0x600   :  { %524 = vadd.xlane.f32.xlu0 %v523_v62 }
 0x616   :  { %528 = vrot.lane.b32.xlu0 %v427_v47, %s3358_s1 }
 0x689   :  { %v525_v63 = vpop.xlane.xlu0 %524 }
 0x68a   :  { %3269 = vrcp.f32 %v525_v63 }
 0x68d   :  { %v529_v0 = vpop.permute.xlu0 %528 }
 0x68e   :  { %3047 = vmatpush3.msra.mxu0 %v529_v0  ;;  %v1120_v0 = vld [vmem:[#allocation3 + $0xf8] sm:$0xff] }
 0x68f   :  { %3051 = vmatprep.subr.mxu0 %v3350_v1  ;;  %3081 = vmatprep.subr.mxu1 %v1120_v0 }
 0x690   :  { %3082 = vmatpush3.msra.mxu1 %v1120_v0 }
 0x697   :  { %v3270_v4 = vpop.eup %3269 }
 0x698   :  { %v527_v6 = vmul.f32 %v3270_v4, %v3268_v61  ;;  %v1119_v4 = vld [vmem:[#allocation3 + $0xf0] sm:$0xff] }
 0x699   :  { %3083 = vmatprep.subr.mxu1 %v1119_v4 }
 0x69a   :  { %3049 = vmatmul.mubr.msk.f32.vlgmr.msra.gmra.mxu0 %vm516_vm1, %v527_v6  ;;  %3084 = vmatpush3.msra.mxu1 %v1119_v4  ;;  %v1117_v6 = vld [vmem:[#allocation3 + $0xe0] sm:$0xff] }
 0x69b   :  { %3052 = vmatpush3.xpose.msk.msra.mxu0 %vm3728_vm2, %v608_v5  ;;  %3053 = vmatprep.mubr.msk.f32.mxu0 %vm3354_vm4, %v3350_v1  ;;  %v1118_v5 = vld [vmem:[#allocation3 + $0xe8] sm:$0xff] }
 0x69c   :  { %3056 = vmatprep.subr.mxu0 %v3350_v1  ;;  %3085 = vmatprep.subr.mxu1 %v1118_v5 }
 0x69d   :  { %3086 = vmatpush3.msra.mxu1 %v1118_v5 }
 0x69e   :  { %3054 = vmatmul.mubr.msk.f32.vlgmr.msra.gmra.mxu0 %vm3729_vm3, %v606_v7  ;;  %3087 = vmatprep.subr.mxu1 %v1117_v6  ;;  %vm3739_vm3 = vmmov %vm3728_vm2 }
 0x69f   :  { %3058 = vmatprep.mubr.msk.f32.mxu0 %vm3354_vm4, %v3350_v1  ;;  %3088 = vmatpush3.msra.mxu1 %v1117_v6 }
 0x75a   :  { %v600_v8 = vpop.f32.mrf.mxu0 }
 0x75b   :  { %604 = vst.msk [vmem:[#allocation2] sm:$0xff] %vm3730_vm5, %v600_v8  ;;  %vm3740_vm5 = vmmov %vm3728_vm2 }
 0x75c   :  { %v3050_v9 = vpop.f32.mrf.mxu0 }
 0x75e   :  { %v679_v10 = vpop.f32.mrf.mxu0 }
 0x75f   :  { %v680_v11 = vadd.f32 %v679_v10, %v3502_v53  ;;  %v2873_v10 = vld [vmem:[#allocation3 + $0x100] ss:$0 sm:$0xff] }
 0x760   :  { %v3055_v12 = vpop.f32.mrf.mxu0 }
 0x761   :  { %v683_v13 = vsel %vm516_vm1, %v680_v11, -inf }
 0x762   :  { %684 = vmax.xlane.f32.xlu1 %v683_v13 }
 0x773   :  { %694 = vrot.lane.b32.xlu1 %v427_v47, %s3359_s27 }
 0x7eb   :  { %v685_v15 = vpop.xlane.xlu1 %684 }
 0x7ec   :  { %v686_v16 = vsub.f32 %v680_v11, %v685_v15 }
 0x7ee   :  { %v687_v17 = vmul.f32 1.442695, %v686_v16 }
 0x7ef   :  { %v695_v18 = vpop.permute.xlu1 %694 }
 0x7f0   :  { %3271 = vpow2.f32 %v687_v17  ;;  %3057 = vmatpush3.msra.mxu0 %v695_v18 }
 0x7f1   :  { %3061 = vmatprep.subr.mxu0 %v3350_v1 }
 0x7fd   :  { %v3272_v20 = vpop.eup %3271 }
 0x7fe   :  { %v689_v14 = vsel %vm516_vm1, %v3272_v20, 0.0 }
 0x7ff   :  { %690 = vadd.xlane.f32.xlu0 %v689_v14 }
 0x815   :  { %781 = vrot.lane.b32.xlu0 %v3485_v45, %s3355_s22 }
 0x888   :  { %v691_v21 = vpop.xlane.xlu0 %690 }
 0x889   :  { %3273 = vrcp.f32 %v691_v21 }
 0x88c   :  { %v782_v24 = vpop.permute.xlu0 %781 }
 0x896   :  { %v3274_v22 = vpop.eup %3273 }
 0x897   :  { %v693_v23 = vmul.f32 %v3274_v22, %v3272_v20 }
 0x899   :  { %3059 = vmatmul.mubr.msk.f32.vlgmr.msra.gmra.mxu0 %vm516_vm1, %v693_v23 }
 0x89a   :  { %3062 = vmatpush3.xpose.msk.msra.mxu0 %vm3731_vm6, %v782_v24  ;;  %3063 = vmatprep.mubr.msk.f32.mxu0 %vm3354_vm4, %v3350_v1  ;;  %vm3741_vm6 = vmmov %vm3728_vm2 }
 0x89b   :  { %3066 = vmatprep.subr.mxu0 %v3350_v1 }
 0x89d   :  { %3064 = vmatmul.mubr.msk.f32.vlgmr.msra.gmra.mxu0 %vm3732_vm7, %v3485_v45  ;;  %vm3742_vm7 = vmmov %vm3728_vm2 }
 0x89e   :  { %3068 = vmatprep.mubr.msk.f32.mxu0 %vm3354_vm4, %v3350_v1 }
 0x959   :  { %v766_v26 = vpop.f32.mrf.mxu0 }
 0x95b   :  { %v3060_v28 = vpop.f32.mrf.mxu0 }
 0x95d   :  { %v853_v29 = vpop.f32.mrf.mxu0 }
 0x95e   :  { %v854_v30 = vadd.f32 %v853_v29, %v3536_v27 }
 0x95f   :  { %v3065_v31 = vpop.f32.mrf.mxu0 }
 0x960   :  { %v857_v32 = vsel %vm516_vm1, %v854_v30, -inf  ;;  %v1250_v31 = vld [vmem:[#allocation3 + $0x120] sm:$0xff] }
 0x961   :  { %858 = vmax.xlane.f32.xlu1 %v857_v32  ;;  %v1249_v32 = vld [vmem:[#allocation3 + $0x118] sm:$0xff] }
 0x972   :  { %868 = vrot.lane.b32.xlu1 %v3485_v45, %s3358_s1 }
 0x976   :  { %945 = vrot.lane.b32.xlu1 %v3485_v45, %s3357_s24 }
 0x9ea   :  { %v859_v33 = vpop.xlane.xlu1 %858 }
 0x9eb   :  { %v860_v2 = vsub.f32 %v854_v30, %v859_v33  ;;  %v1252_v30 = vld [vmem:[#allocation3 + $0x130] sm:$0xff] }
 0x9ed   :  { %v861_v34 = vmul.f32 1.442695, %v860_v2 }
 0x9ee   :  { %v869_v35 = vpop.permute.xlu1 %868 }
 0x9ef   :  { %3275 = vpow2.f32 %v861_v34  ;;  %3067 = vmatpush3.msra.mxu0 %v869_v35 }
 0x9f0   :  { %3071 = vmatprep.subr.mxu0 %v3350_v1 }
 0x9f2   :  { %v946_v44 = vpop.permute.xlu1 %945 }
 0x9fc   :  { %v3276_v36 = vpop.eup %3275 }
 0x9fd   :  { %v863_v37 = vsel %vm516_vm1, %v3276_v36, 0.0 }
 0x9fe   :  { %864 = vadd.xlane.f32.xlu0 %v863_v37 }
 0xa14   :  { %947 = vrot.lane.b32.xlu0 %v3485_v45, %s3356_s23 }
 0xa87   :  { %v865_v38 = vpop.xlane.xlu0 %864 }
 0xa88   :  { %3277 = vrcp.f32 %v865_v38 }
 0xa8b   :  { %v948_v43 = vpop.permute.xlu0 %947 }
 0xa95   :  { %v3278_v39 = vpop.eup %3277 }
 0xa96   :  { %v867_v41 = vmul.f32 %v3278_v39, %v3276_v36  ;;  %v2876_v39 = vld [vmem:[#allocation3 + $0x108] ss:$0 sm:$0xff] }
 0xa98   :  { %3069 = vmatmul.mubr.msk.f32.vlgmr.msra.gmra.mxu0 %vm516_vm1, %v867_v41 }
 0xa99   :  { %3072 = vmatpush3.xpose.msk.msra.mxu0 %vm3733_vm8, %v948_v43  ;;  %3073 = vmatprep.mubr.msk.f32.mxu0 %vm3354_vm4, %v3350_v1  ;;  %v2877_v43 = vld [vmem:[#allocation3 + $0x110] ss:$0 sm:$0xff]  ;;  %vm3743_vm8 = vmmov %vm3728_vm2 }
 0xa9a   :  { %3076 = vmatprep.subr.mxu0 %v3350_v1 }
 0xa9c   :  { %3074 = vmatmul.mubr.msk.f32.vlgmr.msra.gmra.mxu0 %vm3734_vm9, %v946_v44 }
 0xa9d   :  { %3078 = vmatprep.mubr.msk.f32.mxu0 %vm3354_vm4, %v3350_v1 }
 0xb58   :  { %v940_v46 = vpop.f32.mrf.mxu0 }
 0xb59   :  { %944 = vst.msk [vmem:[#allocation2 + $0x8] sm:$0xff] %vm3735_vm11, %v940_v46 }
 0xb5a   :  { %v3070_v47 = vpop.f32.mrf.mxu0 }
 0xb5c   :  { %v1019_v48 = vpop.f32.mrf.mxu0 }
 0xb5d   :  { %v1020_v49 = vadd.f32 %v1019_v48, %v3536_v27 }
 0xb5e   :  { %v3075_v50 = vpop.f32.mrf.mxu0 }
 0xb5f   :  { %v1023_v51 = vsel %vm516_vm1, %v1020_v49, -inf }
 0xb60   :  { %1024 = vmax.xlane.f32.xlu1 %v1023_v51  ;;  %v1364_v51 = vld [vmem:[#allocation3 + $0x178] sm:$0xff] }
 0xb61   :  { %3103 = vmatprep.subr.mxu1 %v1364_v51 }
 0xb71   :  { %771 = vrot.lane.b32.xlu1 %v766_v26, %s3360_s28 }
 0xbe9   :  { %v1025_v52 = vpop.xlane.xlu1 %1024 }
 0xbea   :  { %v1026_v54 = vsub.f32 %v1020_v49, %v1025_v52  ;;  %v1363_v52 = vld [vmem:[#allocation3 + $0x170] sm:$0xff] }
 0xbec   :  { %v1027_v55 = vmul.f32 1.442695, %v1026_v54  ;;  %v1362_v54 = vld [vmem:[#allocation3 + $0x168] sm:$0xff] }
 0xbed   :  { %v772_v56 = vpop.permute.xlu1 %771 }
 0xbee   :  { %3279 = vpow2.f32 %v1027_v55  ;;  %775 = vst.msk [vmem:[#allocation2] sm:$0xff] %vm774_vm12, %v772_v56  ;;  %v1361_v55 = vld [vmem:[#allocation3 + $0x160] sm:$0xff]  ;;  %v1360_v56 = vld [vmem:[#allocation3 + $0x158] sm:$0xff] }
 0xbf5   :  { %v1115_v57 = vld [vmem:[#allocation2] sm:$0xff] }
 0xbf6   :  { %3089 = vmatprep.mubr.msk.f32.mxu1 %vm302_vm0, %v1115_v57  ;;  %v1359_v57 = vld [vmem:[#allocation3 + $0x150] sm:$0xff] }
 0xbfb   :  { %v3280_v58 = vpop.eup %3279 }
 0xbfc   :  { %v1029_v59 = vsel %vm516_vm1, %v3280_v58, 0.0 }
 0xbfd   :  { %1030 = vadd.xlane.f32.xlu0 %v1029_v59  ;;  %v1357_v59 = vld [vmem:[#allocation3 + $0x140] sm:$0xff] }
 0xc13   :  { %1034 = vrot.lane.b32.xlu0 %v3485_v45, %s3359_s27 }
 0xc86   :  { %v1031_v60 = vpop.xlane.xlu0 %1030 }
 0xc87   :  { %3281 = vrcp.f32 %v1031_v60  ;;  %v2878_v60 = vld [vmem:[#allocation3 + $0x138] ss:$0 sm:$0xff] }
 0xc8a   :  { %v1035_v61 = vpop.permute.xlu0 %1034 }
 0xc8b   :  { %3077 = vmatpush3.msra.mxu0 %v1035_v61 }
 0xc8c   :  { %3092 = vmatprep.subr.mxu0 %v1252_v30 }
 0xc94   :  { %v3282_v62 = vpop.eup %3281 }
 0xc95   :  { %v1033_v63 = vmul.f32 %v3282_v62, %v3280_v58  ;;  %v1358_v58 = vld [vmem:[#allocation3 + $0x148] sm:$0xff] }
 0xc97   :  { %3079 = vmatmul.mubr.msk.f32.vlgmr.msra.gmra.mxu0 %vm516_vm1, %v1033_v63 }
 0xc98   :  { %3093 = vmatpush3.msra.mxu0 %v1252_v30 }
 0xd57   :  { %v1106_v45 = vpop.f32.mrf.mxu0 }
 0xd58   :  { %1111 = vrot.lane.b32.xlu1 %v1106_v45, %s3360_s28 }
 0xd59   :  { %v3080_v7 = vpop.f32.mrf.mxu0 }
 0xdca   :  { %v1112_v8 = vpop.permute.xlu1 %1111 }
 0xdcb   :  { %1114 = vst.msk [vmem:[#allocation2 + $0x8] sm:$0xff] %vm774_vm12, %v1112_v8 }
 0xdd2   :  { %v1116_v9 = vld [vmem:[#allocation2 + $0x8] sm:$0xff] }
 0xdd3   :  { %3090 = vmatmul.mubr.msk.f32.vlgmr.msra.gmra.mxu1 %vm302_vm0, %v1116_v9 }
 0xdd4   :  { %3104 = vmatpush3.msra.mxu1 %v1364_v51 }
 0xdd5   :  { %3105 = vmatprep.subr.mxu1 %v1363_v52 }
 0xdd6   :  { %3106 = vmatpush3.msra.mxu1 %v1363_v52 }
 0xdd7   :  { %3107 = vmatprep.subr.mxu1 %v1362_v54 }
 0xdd8   :  { %3108 = vmatpush3.msra.mxu1 %v1362_v54  ;;  %v2884_v54 = vld [vmem:[#allocation3 + $0x188] ss:$0 sm:$0xff] }
 0xdd9   :  { %3109 = vmatprep.subr.mxu1 %v1361_v55 }
 0xdda   :  { %3110 = vmatpush3.msra.mxu1 %v1361_v55 }
 0xddb   :  { %3111 = vmatprep.subr.mxu1 %v1360_v56 }
 0xddc   :  { %3112 = vmatpush3.msra.mxu1 %v1360_v56 }
 0xddd   :  { %3113 = vmatprep.subr.mxu1 %v1359_v57 }
 0xdde   :  { %3114 = vmatpush3.msra.mxu1 %v1359_v57 }
 0xddf   :  { %3115 = vmatprep.subr.mxu1 %v1358_v58 }
 0xde0   :  { %3116 = vmatpush3.msra.mxu1 %v1358_v58 }
 0xde1   :  { %3117 = vmatprep.subr.mxu1 %v1357_v59 }
 0xde2   :  { %3118 = vmatpush3.msra.mxu1 %v1357_v59  ;;  %v2885_v59 = vld [vmem:[#allocation3 + $0x190] ss:$0 sm:$0xff] }
 0xde3   :  { %3143 = vmatprep.subr.mxu1 %v3350_v1 }
 0xe93   :  { %v3091_v11 = vpop.f32.mrf.mxu1 }
 0xe94   :  { %v1204_v12 = vadd.f32 %v3091_v11, %v2873_v10 }
 0xe95   :  { %v1198_v13 = vpop.f32.mrf.mxu1 }
 0xe96   :  { %v1199_v15 = vadd.f32 %v2873_v10, %v1198_v13  ;;  %v1208_v16 = vadd.f32 %v1204_v12, %v3479_v42 }
 0xe98   :  { %v1214_v17 = vsel %vm302_vm0, %v1208_v16, 0.0  ;;  %v1207_v18 = vadd.f32 %v1199_v15, %v3475_v40  ;;  %v1251_v40 = vld [vmem:[#allocation3 + $0x128] sm:$0xff] }
 0xe99   :  { %1215 = vadd.xlane.f32.xlu1 %v1214_v17  ;;  %3094 = vmatprep.subr.mxu0 %v1251_v40 }
 0xe9a   :  { %v1211_v20 = vsel %vm302_vm0, %v1207_v18, 0.0  ;;  %3095 = vmatpush3.msra.mxu0 %v1251_v40 }
 0xe9b   :  { %1212 = vadd.xlane.f32.xlu0 %v1211_v20  ;;  %3096 = vmatprep.subr.mxu0 %v1250_v31 }
 0xe9c   :  { %3097 = vmatpush3.msra.mxu0 %v1250_v31 }
 0xe9d   :  { %3098 = vmatprep.subr.mxu0 %v1249_v32 }
 0xe9e   :  { %3099 = vmatpush3.msra.mxu0 %v1249_v32 }
 0xf22   :  { %v1216_v14 = vpop.xlane.xlu1 %1215 }
 0xf23   :  { %v1218_v21 = vmul.f32 0.03125, %v1216_v14 }
 0xf24   :  { %v1213_v22 = vpop.xlane.xlu0 %1212 }
 0xf25   :  { %v1217_v23 = vmul.f32 0.03125, %v1213_v22  ;;  %v1220_v24 = vsub.f32 %v1208_v16, %v1218_v21  ;;  %v2881_v22 = vld [vmem:[#allocation3 + $0x180] ss:$0 sm:$0xff] }
 0xf27   :  { %v1219_v25 = vsub.f32 %v1207_v18, %v1217_v23  ;;  %v1222_v29 = vmul.f32 %v1220_v24, %v1220_v24 }
 0xf29   :  { %v1221_v26 = vmul.f32 %v1219_v25, %v1219_v25  ;;  %v1226_v42 = vsel %vm302_vm0, %v1222_v29, 0.0 }
 0xf2b   :  { %v1223_v28 = vsel %vm302_vm0, %v1221_v26, 0.0 }
 0xf2c   :  { %1224 = vadd.xlane.f32.xlu0 %v1223_v28 }
 0xf30   :  { %1227 = vadd.xlane.f32.xlu0 %v1226_v42 }
 0xfb5   :  { %v1225_v33 = vpop.xlane.xlu0 %1224 }
 0xfb6   :  { %v1229_v2 = vmul.f32 0.03125, %v1225_v33 }
 0xfb8   :  { %v1231_v34 = vadd.f32 1e-12, %v1229_v2 }
 0xfb9   :  { %v1228_v35 = vpop.xlane.xlu0 %1227 }
 0xfba   :  { %3283 = vrsqrt.f32 %v1231_v34  ;;  %v1230_v36 = vmul.f32 0.03125, %v1228_v35 }
 0xfbc   :  { %v1232_v37 = vadd.f32 1e-12, %v1230_v36 }
 0xfbe   :  { %3285 = vrsqrt.f32 %v1232_v37 }
 0xfc7   :  { %v3284_v38 = vpop.eup %3283 }
 0xfc8   :  { %v1235_v41 = vmul.f32 %v3284_v38, %v1219_v25 }
 0xfca   :  { %v1241_v44 = vmul.f32 %v2876_v39, %v1235_v41  ;;  %v1496_v41 = vld [vmem:[#allocation3 + $0x1a8] sm:$0xff] }
 0xfcb   :  { %v3286_v46 = vpop.eup %3285 }
 0xfcc   :  { %v1236_v47 = vmul.f32 %v3286_v46, %v1220_v24  ;;  %v3575_v48 = vadd.f32 %v2877_v43, %v1241_v44  ;;  %v1494_v44 = vld [vmem:[#allocation3 + $0x198] sm:$0xff] }
 0xfce   :  { %v1242_v49 = vmul.f32 %v2876_v39, %v1236_v47  ;;  %3100 = vmatprep.mubr.msk.f32.mxu0 %vm302_vm0, %v3575_v48  ;;  %v1497_v39 = vld [vmem:[#allocation3 + $0x1b0] sm:$0xff] }
 0xfcf   :  { %3122 = vmatprep.subr.mxu0 %v1497_v39 }
 0xfd0   :  { %v1248_v50 = vadd.f32 %v2877_v43, %v1242_v49  ;;  %v1495_v43 = vld [vmem:[#allocation3 + $0x1a0] sm:$0xff] }
 0xfd2   :  { %3101 = vmatmul.mubr.msk.f32.vlgmr.msra.gmra.mxu0 %vm302_vm0, %v1248_v50 }
 0xfd3   :  { %3123 = vmatpush3.msra.mxu0 %v1497_v39 }
 0xfd4   :  { %3124 = vmatprep.subr.mxu0 %v1496_v41 }
 0xfd5   :  { %3125 = vmatpush3.msra.mxu0 %v1496_v41 }
 0xfd6   :  { %3126 = vmatprep.subr.mxu0 %v1495_v43 }
 0xfd7   :  { %3127 = vmatpush3.msra.mxu0 %v1495_v43 }
 0xfd8   :  { %3128 = vmatprep.subr.mxu0 %v1494_v44 }
 0xfd9   :  { %3129 = vmatpush3.msra.mxu0 %v1494_v44 }
 0xfda   :  { %3133 = vmatprep.subr.mxu0 %v3350_v1 }
0x1092   :  { %v3102_v61 = vpop.f32.mrf.mxu0 }
0x1093   :  { %v1336_v62 = vadd.f32 %v3102_v61, %v2878_v60 }
0x1094   :  { %v1330_v63 = vpop.f32.mrf.mxu0 }
0x1095   :  { %v1342_v0 = vmul.f32 0.044715, %v1336_v62  ;;  %v1331_v4 = vadd.f32 %v2878_v60, %v1330_v63  ;;  %v1340_v20 = vmul.f32 0.5, %v1336_v62 }
0x1097   :  { %v1344_v5 = vmul.f32 %v1342_v0, %v1336_v62  ;;  %v1341_v6 = vmul.f32 0.044715, %v1331_v4  ;;  %v1339_v17 = vmul.f32 0.5, %v1331_v4  ;;  %v2886_v0 = vld [vmem:[#allocation3 + $0x1b8] ss:$0 sm:$0xff] }
0x1099   :  { %v1346_v45 = vmul.f32 %v1344_v5, %v1336_v62  ;;  %v1343_v7 = vmul.f32 %v1341_v6, %v1331_v4 }
0x109b   :  { %v1348_v8 = vadd.f32 %v1346_v45, %v1336_v62  ;;  %v1345_v9 = vmul.f32 %v1343_v7, %v1331_v4 }
0x109d   :  { %v1350_v10 = vmul.f32 0.7978846, %v1348_v8  ;;  %v1347_v11 = vadd.f32 %v1345_v9, %v1331_v4 }
0x109f   :  { %3287 = vtanh.f32 %v1350_v10  ;;  %v1349_v12 = vmul.f32 0.7978846, %v1347_v11 }
0x10a1   :  { %3289 = vtanh.f32 %v1349_v12 }
0x10ac   :  { %v3288_v13 = vpop.eup %3287 }
0x10ad   :  { %v1354_v16 = vadd.f32 1.0, %v3288_v13 }
0x10ae   :  { %v3290_v15 = vpop.eup %3289 }
0x10af   :  { %v1353_v18 = vadd.f32 1.0, %v3290_v15  ;;  %v1356_v21 = vmul.f32 %v1354_v16, %v1340_v20 }
0x10b1   :  { %v1355_v14 = vmul.f32 %v1353_v18, %v1339_v17 }
0x10b3   :  { %3119 = vmatprep.mubr.msk.f32.mxu1 %vm1370_vm13, %v1355_v14 }
0x10b4   :  { %3120 = vmatmul.mubr.msk.f32.vlgmr.msra.gmra.mxu1 %vm1370_vm13, %v1356_v21 }
0x10b5   :  { %3145 = vmatprep.mubr.msk.f32.mxu1 %vm3354_vm4, %v3350_v1 }
0x1174   :  { %v3121_v23 = vpop.f32.mrf.mxu1 }
0x1175   :  { %v1449_v24 = vadd.f32 %v3121_v23, %v2881_v22 }
0x1176   :  { %v1443_v25 = vpop.f32.mrf.mxu1 }
0x1177   :  { %v1444_v26 = vadd.f32 %v2881_v22, %v1443_v25  ;;  %v1453_v28 = vadd.f32 %v1449_v24, %v1248_v50 }
0x1179   :  { %v1459_v29 = vsel %vm302_vm0, %v1453_v28, 0.0  ;;  %v1452_v42 = vadd.f32 %v1444_v26, %v3575_v48 }
0x117a   :  { %1460 = vadd.xlane.f32.xlu0 %v1459_v29 }
0x117b   :  { %v1456_v30 = vsel %vm302_vm0, %v1452_v42, 0.0 }
0x117c   :  { %1457 = vadd.xlane.f32.xlu1 %v1456_v30 }
0x1203   :  { %v1461_v40 = vpop.xlane.xlu0 %1460 }
0x1204   :  { %v1463_v31 = vmul.f32 0.03125, %v1461_v40 }
0x1205   :  { %v1458_v32 = vpop.xlane.xlu1 %1457 }
0x1206   :  { %v1465_v33 = vsub.f32 %v1453_v28, %v1463_v31  ;;  %v1462_v2 = vmul.f32 0.03125, %v1458_v32 }
0x1208   :  { %v1464_v34 = vsub.f32 %v1452_v42, %v1462_v2  ;;  %v1467_v35 = vmul.f32 %v1465_v33, %v1465_v33 }
0x120a   :  { %v1471_v36 = vsel %vm302_vm0, %v1467_v35, 0.0  ;;  %v1466_v37 = vmul.f32 %v1464_v34, %v1464_v34 }
0x120b   :  { %1472 = vadd.xlane.f32.xlu0 %v1471_v36 }
0x120c   :  { %v1468_v38 = vsel %vm302_vm0, %v1466_v37, 0.0 }
0x120d   :  { %1469 = vadd.xlane.f32.xlu1 %v1468_v38 }
0x1294   :  { %v1473_v46 = vpop.xlane.xlu0 %1472 }
0x1295   :  { %v1475_v47 = vmul.f32 0.03125, %v1473_v46 }
0x1296   :  { %v1470_v48 = vpop.xlane.xlu1 %1469 }
0x1297   :  { %v1477_v49 = vadd.f32 1e-12, %v1475_v47  ;;  %v1474_v50 = vmul.f32 0.03125, %v1470_v48 }
0x1299   :  { %3291 = vrsqrt.f32 %v1477_v49  ;;  %v1476_v51 = vadd.f32 1e-12, %v1474_v50 }
0x129b   :  { %3293 = vrsqrt.f32 %v1476_v51 }
0x12a6   :  { %v3292_v52 = vpop.eup %3291 }
0x12a7   :  { %v1481_v55 = vmul.f32 %v3292_v52, %v1465_v33 }
0x12a8   :  { %v3294_v56 = vpop.eup %3293 }
0x12a9   :  { %v1480_v57 = vmul.f32 %v3294_v56, %v1464_v34  ;;  %v1487_v58 = vmul.f32 %v2884_v54, %v1481_v55 }
0x12ab   :  { %v1486_v60 = vmul.f32 %v2884_v54, %v1480_v57  ;;  %v3593_v62 = vadd.f32 %v2885_v59, %v1487_v58 }
0x12ad   :  { %v3591_v61 = vadd.f32 %v2885_v59, %v1486_v60 }
0x12af   :  { %3130 = vmatprep.mubr.msk.f32.mxu0 %vm302_vm0, %v3591_v61 }
0x12b0   :  { %3131 = vmatmul.mubr.msk.f32.vlgmr.msra.gmra.mxu0 %vm302_vm0, %v3593_v62 }
0x12b1   :  { %3135 = vmatprep.mubr.msk.f32.mxu0 %vm3354_vm4, %v3350_v1 }
0x1370   :  { %v3132_v63 = vpop.f32.mrf.mxu0 }
0x1371   :  { %v3607_v6 = vadd.f32 %v3132_v63, %v2886_v0 }
0x1372   :  { %v1575_v4 = vpop.f32.mrf.mxu0 }
0x1373   :  { %v3601_v5 = vadd.f32 %v2886_v0, %v1575_v4 }
0x1375   :  { %1751 = vrot.lane.b32.xlu0 %v3601_v5, %s3356_s23  ;;  %1585 = vrot.lane.b32.xlu1 %v3601_v5, %s3355_s22 }
0x1379   :  { %2086 = vrot.lane.b32.xlu0 %v3607_v6, %s3356_s23  ;;  %1749 = vrot.lane.b32.xlu1 %v3601_v5, %s3357_s24 }
0x137d   :  { %1920 = vrot.lane.b32.xlu1 %v3607_v6, %s3355_s22 }
0x1381   :  { %2084 = vrot.lane.b32.xlu1 %v3607_v6, %s3357_s24 }
0x13e7   :  { %v1752_v45 = vpop.permute.xlu0 %1751  ;;  %v1586_v7 = vpop.permute.xlu1 %1585 }
0x13e8   :  { %3134 = vmatpush3.xpose.msk.msra.mxu0 %vm3736_vm10, %v1586_v7  ;;  %3144 = vmatpush3.xpose.msk.msra.mxu1 %vm3737_vm14, %v1752_v45  ;;  %v2259_v45 = vld [vmem:[#allocation3 + $0x1d8] sm:$0xff]  ;;  %v2258_v7 = vld [vmem:[#allocation3 + $0x1d0] sm:$0xff]  ;;  %vm2818_vm14 = vcmp.eq.s32.totalorder %v3389_v3, 1 }
0x13e9   :  { %3153 = vmatprep.subr.mxu1 %v3350_v1  ;;  %3138 = vmatprep.subr.mxu0 %v3350_v1 }
0x13eb   :  { %3136 = vmatmul.mubr.msk.f32.vlgmr.msra.gmra.mxu0 %vm3738_vm15, %v3601_v5  ;;  %v1750_v8 = vpop.permute.xlu1 %1749  ;;  %v2087_v10 = vpop.permute.xlu0 %2086 }
0x13ec   :  { %3146 = vmatmul.mubr.msk.f32.vlgmr.msra.gmra.mxu1 %vm3728_vm2, %v1750_v8  ;;  %3140 = vmatprep.mubr.msk.f32.mxu0 %vm3354_vm4, %v3350_v1 }
0x13ed   :  { %3155 = vmatprep.mubr.msk.f32.mxu1 %vm3354_vm4, %v3350_v1 }
0x13ef   :  { %v1921_v9 = vpop.permute.xlu1 %1920 }
0x13f0   :  { %3154 = vmatpush3.xpose.msk.msra.mxu1 %vm3739_vm3, %v1921_v9  ;;  %v2257_v9 = vld [vmem:[#allocation3 + $0x1c8] sm:$0xff] }
0x13f1   :  { %3163 = vmatprep.subr.mxu1 %v3350_v1 }
0x13f3   :  { %3156 = vmatmul.mubr.msk.f32.vlgmr.msra.gmra.mxu1 %vm3740_vm5, %v3607_v6  ;;  %v2085_v11 = vpop.permute.xlu1 %2084 }
0x13f4   :  { %3164 = vmatpush3.xpose.msk.msra.mxu1 %vm3741_vm6, %v2087_v10  ;;  %3165 = vmatprep.mubr.msk.f32.mxu1 %vm3354_vm4, %v3350_v1  ;;  %vm2833_vm6 = vcmask 23552  }
0x13f5   :  { %3173 = vmatprep.subr.mxu1 %v2259_v45 }
0x13f7   :  { %3166 = vmatmul.mubr.msk.f32.vlgmr.msra.gmra.mxu1 %vm3742_vm7, %v2085_v11  ;;  %v2256_v11 = vld [vmem:[#allocation3 + $0x1c0] sm:$0xff] }
0x13f8   :  { %3174 = vmatpush3.msra.mxu1 %v2259_v45  ;;  %v2501_v45 = vld [vmem:[#allocation3 + $0x248] sm:$0xff] }
0x13f9   :  { %3175 = vmatprep.subr.mxu1 %v2258_v7 }
0x13fa   :  { %3176 = vmatpush3.msra.mxu1 %v2258_v7  ;;  %v2500_v7 = vld [vmem:[#allocation3 + $0x240] sm:$0xff] }
0x13fb   :  { %3177 = vmatprep.subr.mxu1 %v2257_v9 }
0x13fc   :  { %3178 = vmatpush3.msra.mxu1 %v2257_v9  ;;  %v2497_v9 = vld [vmem:[#allocation3 + $0x228] sm:$0xff] }
0x13fd   :  { %3179 = vmatprep.subr.mxu1 %v2256_v11 }
0x13fe   :  { %3180 = vmatpush3.msra.mxu1 %v2256_v11 }
0x14ab   :  { %v1657_v12 = vpop.f32.mrf.mxu0 }
0x14ac   :  { %v1658_v13 = vadd.f32 %v1657_v12, %v3502_v53  ;;  %v1823_v15 = vpop.f32.mrf.mxu1 }
0x14ad   :  { %v1824_v16 = vadd.f32 %v1823_v15, %v3502_v53  ;;  %v3137_v17 = vpop.f32.mrf.mxu0 }
0x14ae   :  { %v3147_v18 = vpop.f32.mrf.mxu1  ;;  %v1661_v20 = vsel %vm516_vm1, %v1658_v13, -inf }
0x14af   :  { %1662 = vmax.xlane.f32.xlu0 %v1661_v20  ;;  %v1827_v14 = vsel %vm516_vm1, %v1824_v16, -inf }
0x14b0   :  { %1828 = vmax.xlane.f32.xlu1 %v1827_v14 }
0x14b3   :  { %v1992_v21 = vpop.f32.mrf.mxu1 }
0x14b4   :  { %v1993_v22 = vadd.f32 %v1992_v21, %v3536_v27  ;;  %v2901_v21 = vld [vmem:[#allocation3 + $0x1e0] ss:$0 sm:$0xff] }
0x14b5   :  { %v3157_v23 = vpop.f32.mrf.mxu1 }
0x14b6   :  { %v1996_v24 = vsel %vm516_vm1, %v1993_v22, -inf }
0x14b7   :  { %1997 = vmax.xlane.f32.xlu0 %v1996_v24  ;;  %v2158_v25 = vpop.f32.mrf.mxu1 }
0x14b8   :  { %v2159_v26 = vadd.f32 %v2158_v25, %v3536_v27 }
0x14b9   :  { %v3167_v28 = vpop.f32.mrf.mxu1 }
0x14ba   :  { %v2162_v53 = vsel %vm516_vm1, %v2159_v26, -inf }
0x14bb   :  { %2163 = vmax.xlane.f32.xlu0 %v2162_v53 }
0x14c1   :  { %1672 = vrot.lane.b32.xlu1 %v3601_v5, %s3358_s1 }
0x1538   :  { %v1663_v29 = vpop.xlane.xlu0 %1662 }
0x1539   :  { %v1664_v42 = vsub.f32 %v1658_v13, %v1663_v29  ;;  %v1829_v30 = vpop.xlane.xlu1 %1828 }
0x153a   :  { %v1830_v40 = vsub.f32 %v1824_v16, %v1829_v30 }
0x153b   :  { %v1665_v31 = vmul.f32 1.442695, %v1664_v42 }
0x153c   :  { %v1831_v32 = vmul.f32 1.442695, %v1830_v40 }
0x153d   :  { %3295 = vpow2.f32 %v1665_v31  ;;  %v1673_v33 = vpop.permute.xlu1 %1672 }
0x153e   :  { %3297 = vpow2.f32 %v1831_v32  ;;  %3139 = vmatpush3.msra.mxu0 %v1673_v33 }
0x153f   :  { %3148 = vmatprep.subr.mxu0 %v3350_v1 }
0x1540   :  { %v1998_v27 = vpop.xlane.xlu0 %1997 }
0x1541   :  { %v1999_v2 = vsub.f32 %v1993_v22, %v1998_v27 }
0x1543   :  { %v2000_v34 = vmul.f32 1.442695, %v1999_v2 }
0x1544   :  { %v2164_v35 = vpop.xlane.xlu0 %2163 }
0x1545   :  { %3299 = vpow2.f32 %v2000_v34  ;;  %v2165_v36 = vsub.f32 %v2159_v26, %v2164_v35 }
0x1547   :  { %v2166_v37 = vmul.f32 1.442695, %v2165_v36  ;;  %v2391_v36 = vld [vmem:[#allocation3 + $0x210] sm:$0xff] }
0x1549   :  { %3301 = vpow2.f32 %v2166_v37  ;;  %v2390_v37 = vld [vmem:[#allocation3 + $0x208] sm:$0xff] }
0x154a   :  { %v3296_v38 = vpop.eup %3295 }
0x154b   :  { %v3298_v39 = vpop.eup %3297  ;;  %v1667_v41 = vsel %vm516_vm1, %v3296_v38, 0.0 }
0x154c   :  { %1668 = vadd.xlane.f32.xlu1 %v1667_v41  ;;  %v1833_v43 = vsel %vm516_vm1, %v3298_v39, 0.0  ;;  %v2639_v41 = vld [vmem:[#allocation3 + $0x2b0] sm:$0xff] }
0x154d   :  { %1834 = vadd.xlane.f32.xlu0 %v1833_v43 }
0x1552   :  { %v3300_v44 = vpop.eup %3299 }
0x1553   :  { %v2002_v46 = vsel %vm516_vm1, %v3300_v44, 0.0 }
0x1554   :  { %2003 = vadd.xlane.f32.xlu1 %v2002_v46 }
0x1556   :  { %v3302_v47 = vpop.eup %3301 }
0x1557   :  { %v2168_v48 = vsel %vm516_vm1, %v3302_v47, 0.0 }
0x1558   :  { %2169 = vadd.xlane.f32.xlu0 %v2168_v48 }
0x1565   :  { %2007 = vrot.lane.b32.xlu1 %v3607_v6, %s3358_s1 }
0x1569   :  { %2173 = vrot.lane.b32.xlu1 %v3607_v6, %s3359_s27 }
0x156e   :  { %1838 = vrot.lane.b32.xlu0 %v3601_v5, %s3359_s27 }
0x15d5   :  { %v1669_v49 = vpop.xlane.xlu1 %1668 }
0x15d6   :  { %3303 = vrcp.f32 %v1669_v49  ;;  %v1835_v50 = vpop.xlane.xlu0 %1834 }
0x15d7   :  { %3305 = vrcp.f32 %v1835_v50 }
0x15dd   :  { %v2004_v51 = vpop.xlane.xlu1 %2003 }
0x15de   :  { %3307 = vrcp.f32 %v2004_v51  ;;  %v2904_v51 = vld [vmem:[#allocation3 + $0x1e8] ss:$0 sm:$0xff] }
0x15e1   :  { %v2170_v52 = vpop.xlane.xlu0 %2169  ;;  %v2008_v58 = vpop.permute.xlu1 %2007 }
0x15e2   :  { %3309 = vrcp.f32 %v2170_v52 }
0x15e3   :  { %v3304_v54 = vpop.eup %3303 }
0x15e4   :  { %v1671_v55 = vmul.f32 %v3304_v54, %v3296_v38  ;;  %v3306_v56 = vpop.eup %3305  ;;  %v2389_v38 = vld [vmem:[#allocation3 + $0x200] sm:$0xff]  ;;  %v2905_v54 = vld [vmem:[#allocation3 + $0x1f0] ss:$0 sm:$0xff] }
0x15e5   :  { %v1839_v57 = vpop.permute.xlu0 %1838  ;;  %v1837_v59 = vmul.f32 %v3306_v56, %v3298_v39  ;;  %v2174_v0 = vpop.permute.xlu1 %2173  ;;  %v2388_v39 = vld [vmem:[#allocation3 + $0x1f8] sm:$0xff] }
0x15e6   :  { %3141 = vmatmul.mubr.msk.f32.vlgmr.msra.gmra.mxu0 %vm516_vm1, %v1671_v55 }
0x15e7   :  { %3149 = vmatpush3.msra.mxu0 %v1839_v57  ;;  %3150 = vmatprep.mubr.msk.f32.mxu0 %vm3354_vm4, %v3350_v1 }
0x15e8   :  { %3158 = vmatprep.subr.mxu0 %v3350_v1 }
0x15ea   :  { %3151 = vmatmul.mubr.msk.f32.vlgmr.msra.gmra.mxu0 %vm516_vm1, %v1837_v59 }
0x15eb   :  { %v3308_v60 = vpop.eup %3307  ;;  %3159 = vmatpush3.msra.mxu0 %v2008_v58  ;;  %3160 = vmatprep.mubr.msk.f32.mxu0 %vm3354_vm4, %v3350_v1 }
0x15ec   :  { %3168 = vmatprep.subr.mxu0 %v3350_v1  ;;  %v2006_v63 = vmul.f32 %v3308_v60, %v3300_v44 }
0x15ee   :  { %3161 = vmatmul.mubr.msk.f32.vlgmr.msra.gmra.mxu0 %vm516_vm1, %v2006_v63  ;;  %v2638_v63 = vld [vmem:[#allocation3 + $0x2a8] sm:$0xff] }
0x15ef   :  { %v3310_v4 = vpop.eup %3309  ;;  %3169 = vmatpush3.msra.mxu0 %v2174_v0  ;;  %3170 = vmatprep.mubr.msk.f32.mxu0 %vm3354_vm4, %v3350_v1  ;;  %vm3744_vm4 = vmmov %vm3728_vm2  ;;  %v2637_v0 = vld [vmem:[#allocation3 + $0x2a0] sm:$0xff] }
0x15f0   :  { %v2172_v5 = vmul.f32 %v3310_v4, %v3302_v47  ;;  %3184 = vmatprep.subr.mxu0 %v2391_v36  ;;  %v2636_v4 = vld [vmem:[#allocation3 + $0x298] sm:$0xff] }
0x15f2   :  { %3171 = vmatmul.mubr.msk.f32.vlgmr.msra.gmra.mxu0 %vm516_vm1, %v2172_v5  ;;  %v2503_v5 = vld [vmem:[#allocation3 + $0x258] sm:$0xff] }
0x15f3   :  { %3185 = vmatpush3.msra.mxu0 %v2391_v36  ;;  %3195 = vmatprep.subr.mxu1 %v2503_v5 }
0x15f4   :  { %3186 = vmatprep.subr.mxu0 %v2390_v37 }
0x15f5   :  { %3187 = vmatpush3.msra.mxu0 %v2390_v37 }
0x15f6   :  { %3188 = vmatprep.subr.mxu0 %v2389_v38 }
0x15f7   :  { %3189 = vmatpush3.msra.mxu0 %v2389_v38 }
0x15f8   :  { %3190 = vmatprep.subr.mxu0 %v2388_v39 }
0x15f9   :  { %3191 = vmatpush3.msra.mxu0 %v2388_v39 }
0x15fa   :  { %3214 = vmatprep.subr.mxu0 %v2639_v41 }
0x16a6   :  { %v1744_v6 = vpop.f32.mrf.mxu0 }
0x16a7   :  { %1748 = vst.msk [vmem:[#allocation2] sm:$0xff] %vm3743_vm8, %v1744_v6  ;;  %v2502_v6 = vld [vmem:[#allocation3 + $0x250] sm:$0xff] }
0x16a8   :  { %v3142_v8 = vpop.f32.mrf.mxu0 }
0x16a9   :  { %v2498_v8 = vld [vmem:[#allocation3 + $0x230] sm:$0xff] }
0x16aa   :  { %v1910_v10 = vpop.f32.mrf.mxu0 }
0x16ab   :  { %1915 = vrot.lane.b32.xlu0 %v1910_v10, %s3360_s28  ;;  %v2906_v10 = vld [vmem:[#allocation3 + $0x218] ss:$0 sm:$0xff] }
0x16ac   :  { %v3152_v1 = vpop.f32.mrf.mxu0 }
0x16ae   :  { %v2079_v12 = vpop.f32.mrf.mxu0 }
0x16af   :  { %2083 = vst.msk [vmem:[#allocation2 + $0x8] sm:$0xff] %vm3744_vm4, %v2079_v12 }
0x16b0   :  { %v3162_v13 = vpop.f32.mrf.mxu0 }
0x16b2   :  { %v2245_v15 = vpop.f32.mrf.mxu0 }
0x16b3   :  { %2250 = vrot.lane.b32.xlu1 %v2245_v15, %s3360_s28 }
0x16b4   :  { %v3172_v16 = vpop.f32.mrf.mxu0 }
0x171d   :  { %v1916_v17 = vpop.permute.xlu0 %1915 }
0x171e   :  { %1918 = vst.msk [vmem:[#allocation2] sm:$0xff] %vm774_vm12, %v1916_v17 }
0x1725   :  { %v2251_v18 = vpop.permute.xlu1 %2250  ;;  %v2254_v20 = vld [vmem:[#allocation2] sm:$0xff] }
0x1726   :  { %2253 = vst.msk [vmem:[#allocation2 + $0x8] sm:$0xff] %vm774_vm12, %v2251_v18  ;;  %3181 = vmatprep.mubr.msk.f32.mxu1 %vm302_vm0, %v2254_v20 }
0x172d   :  { %v2255_v14 = vld [vmem:[#allocation2 + $0x8] sm:$0xff] }
0x172e   :  { %3182 = vmatmul.mubr.msk.f32.vlgmr.msra.gmra.mxu1 %vm302_vm0, %v2255_v14 }
0x172f   :  { %3196 = vmatpush3.msra.mxu1 %v2503_v5 }
0x1730   :  { %3197 = vmatprep.subr.mxu1 %v2502_v6 }
0x1731   :  { %3198 = vmatpush3.msra.mxu1 %v2502_v6 }
0x1732   :  { %3199 = vmatprep.subr.mxu1 %v2501_v45 }
0x1733   :  { %3200 = vmatpush3.msra.mxu1 %v2501_v45 }
0x1734   :  { %3201 = vmatprep.subr.mxu1 %v2500_v7 }
0x1735   :  { %3202 = vmatpush3.msra.mxu1 %v2500_v7 }
0x17ee   :  { %v3183_v22 = vpop.f32.mrf.mxu1 }
0x17ef   :  { %v2343_v23 = vadd.f32 %v3183_v22, %v2901_v21 }
0x17f0   :  { %v2337_v24 = vpop.f32.mrf.mxu1 }
0x17f1   :  { %v2338_v25 = vadd.f32 %v2901_v21, %v2337_v24  ;;  %v2347_v26 = vadd.f32 %v2343_v23, %v3593_v62 }
0x17f3   :  { %v2353_v28 = vsel %vm302_vm0, %v2347_v26, 0.0  ;;  %v2346_v53 = vadd.f32 %v2338_v25, %v3591_v61 }
0x17f4   :  { %2354 = vadd.xlane.f32.xlu1 %v2353_v28 }
0x17f5   :  { %v2350_v29 = vsel %vm302_vm0, %v2346_v53, 0.0 }
0x17f6   :  { %2351 = vadd.xlane.f32.xlu0 %v2350_v29 }
0x187d   :  { %v2355_v42 = vpop.xlane.xlu1 %2354 }
0x187e   :  { %v2357_v30 = vmul.f32 0.03125, %v2355_v42 }
0x187f   :  { %v2352_v40 = vpop.xlane.xlu0 %2351 }
0x1880   :  { %v2356_v31 = vmul.f32 0.03125, %v2352_v40  ;;  %v2359_v32 = vsub.f32 %v2347_v26, %v2357_v30 }
0x1882   :  { %v2358_v33 = vsub.f32 %v2346_v53, %v2356_v31  ;;  %v2361_v34 = vmul.f32 %v2359_v32, %v2359_v32  ;;  %v2909_v31 = vld [vmem:[#allocation3 + $0x260] ss:$0 sm:$0xff] }
0x1884   :  { %v2360_v27 = vmul.f32 %v2358_v33, %v2358_v33  ;;  %v2365_v35 = vsel %vm302_vm0, %v2361_v34, 0.0 }
0x1886   :  { %v2362_v2 = vsel %vm302_vm0, %v2360_v27, 0.0 }
0x1887   :  { %2363 = vadd.xlane.f32.xlu0 %v2362_v2 }
0x188b   :  { %2366 = vadd.xlane.f32.xlu0 %v2365_v35 }
0x1910   :  { %v2364_v43 = vpop.xlane.xlu0 %2363 }
0x1911   :  { %v2368_v44 = vmul.f32 0.03125, %v2364_v43 }
0x1913   :  { %v2370_v46 = vadd.f32 1e-12, %v2368_v44 }
0x1914   :  { %v2367_v47 = vpop.xlane.xlu0 %2366 }
0x1915   :  { %3311 = vrsqrt.f32 %v2370_v46  ;;  %v2369_v48 = vmul.f32 0.03125, %v2367_v47 }
0x1917   :  { %v2371_v49 = vadd.f32 1e-12, %v2369_v48 }
0x1919   :  { %3313 = vrsqrt.f32 %v2371_v49 }
0x1922   :  { %v3312_v50 = vpop.eup %3311 }
0x1923   :  { %v2374_v52 = vmul.f32 %v3312_v50, %v2358_v33 }
0x1925   :  { %v2380_v55 = vmul.f32 %v2904_v51, %v2374_v52  ;;  %v2634_v52 = vld [vmem:[#allocation3 + $0x288] sm:$0xff] }
0x1926   :  { %v3314_v56 = vpop.eup %3313 }
0x1927   :  { %v2375_v57 = vmul.f32 %v3314_v56, %v2359_v32  ;;  %v3683_v58 = vadd.f32 %v2905_v54, %v2380_v55  ;;  %v2632_v55 = vld [vmem:[#allocation3 + $0x278] sm:$0xff]  ;;  %v3323_v56 = vld [vmem:[%s3721_s0] sm:$0xff] }
0x1928   :  { %vm2804_vm1 = vcmp.ne.s32.totalorder %v3323_v56, 0 }
0x1929   :  { %v2381_v59 = vmul.f32 %v2904_v51, %v2375_v57  ;;  %3192 = vmatprep.mubr.msk.f32.mxu0 %vm302_vm0, %v3683_v58  ;;  %v2635_v51 = vld [vmem:[#allocation3 + $0x290] sm:$0xff]  ;;  %v3324_v57 = vld [vmem:[%s3721_s0 + $0x8] sm:$0xff] }
0x192a   :  { %vm2805_vm9 = vcmp.ne.s32.totalorder %v3324_v57, 0 }
0x192b   :  { %v3687_v60 = vadd.f32 %v2905_v54, %v2381_v59  ;;  %v2633_v54 = vld [vmem:[#allocation3 + $0x280] sm:$0xff]  ;;  %v2806_v59 = vsel %vm2804_vm1, 1, %v3352_v19 }
0x192d   :  { %3193 = vmatmul.mubr.msk.f32.vlgmr.msra.gmra.mxu0 %vm302_vm0, %v3687_v60 }
0x192e   :  { %3215 = vmatpush3.msra.mxu0 %v2639_v41  ;;  %3222 = vmatprep.mubr.msk.f32.mxu0 %vm302_vm0, %v3591_v61  ;;  %v2499_v61 = vld [vmem:[#allocation3 + $0x238] sm:$0xff] }
0x192f   :  { %3216 = vmatprep.subr.mxu0 %v2638_v63  ;;  %3203 = vmatprep.subr.mxu1 %v2499_v61 }
0x1930   :  { %3217 = vmatpush3.msra.mxu0 %v2638_v63  ;;  %3204 = vmatpush3.msra.mxu1 %v2499_v61  ;;  %v3362_v63 = vmov 3  }
0x1931   :  { %3218 = vmatprep.subr.mxu0 %v2637_v0  ;;  %3205 = vmatprep.subr.mxu1 %v2498_v8 }
0x1932   :  { %3219 = vmatpush3.msra.mxu0 %v2637_v0  ;;  %3206 = vmatpush3.msra.mxu1 %v2498_v8  ;;  %v2912_v8 = vld [vmem:[#allocation3 + $0x268] ss:$0 sm:$0xff] }
0x1933   :  { %3220 = vmatprep.subr.mxu0 %v2636_v4  ;;  %3207 = vmatprep.subr.mxu1 %v2497_v9 }
0x1934   :  { %3221 = vmatpush3.msra.mxu0 %v2636_v4  ;;  %3208 = vmatpush3.msra.mxu1 %v2497_v9 }
0x1935   :  { %3223 = vmatmul.mubr.msk.f32.vlgmr.msra.gmra.mxu0 %vm302_vm0, %v3593_v62  ;;  %v2496_v62 = vld [vmem:[#allocation3 + $0x220] sm:$0xff]  ;;  %3225 = vmatprep.subr.mxu0 %v2635_v51 }
0x1936   :  { %3209 = vmatprep.subr.mxu1 %v2496_v62  ;;  %3226 = vmatpush3.msra.mxu0 %v2635_v51 }
0x1937   :  { %3210 = vmatpush3.msra.mxu1 %v2496_v62  ;;  %3227 = vmatprep.subr.mxu0 %v2634_v52 }
0x1938   :  { %3228 = vmatpush3.msra.mxu0 %v2634_v52 }
0x1939   :  { %3229 = vmatprep.subr.mxu0 %v2633_v54 }
0x193a   :  { %3230 = vmatpush3.msra.mxu0 %v2633_v54 }
0x193b   :  { %3231 = vmatprep.subr.mxu0 %v2632_v55 }
0x193c   :  { %3232 = vmatpush3.msra.mxu0 %v2632_v55 }
0x19ed   :  { %v3194_v11 = vpop.f32.mrf.mxu0 }
0x19ee   :  { %v2475_v1 = vadd.f32 %v3194_v11, %v2906_v10  ;;  %v2913_v11 = vld [vmem:[#allocation3 + $0x270] ss:$0 sm:$0xff] }
0x19ef   :  { %v2469_v12 = vpop.f32.mrf.mxu0 }
0x19f0   :  { %v2481_v13 = vmul.f32 0.044715, %v2475_v1  ;;  %v2470_v15 = vadd.f32 %v2906_v10, %v2469_v12  ;;  %v2479_v42 = vmul.f32 0.5, %v2475_v1 }
0x19f2   :  { %v2483_v16 = vmul.f32 %v2481_v13, %v2475_v1  ;;  %v2480_v17 = vmul.f32 0.044715, %v2470_v15  ;;  %v2478_v53 = vmul.f32 0.5, %v2470_v15 }
0x19f4   :  { %v2485_v18 = vmul.f32 %v2483_v16, %v2475_v1  ;;  %v2482_v20 = vmul.f32 %v2480_v17, %v2470_v15 }
0x19f5   :  { %v3224_v17 = vpop.f32.mrf.mxu0 }
0x19f6   :  { %v2487_v14 = vadd.f32 %v2485_v18, %v2475_v1  ;;  %v2484_v21 = vmul.f32 %v2482_v20, %v2470_v15 }
0x19f8   :  { %v2489_v22 = vmul.f32 0.7978846, %v2487_v14  ;;  %v2486_v23 = vadd.f32 %v2484_v21, %v2470_v15  ;;  %v2706_v14 = vpop.f32.mrf.mxu0 }
0x19fa   :  { %3315 = vtanh.f32 %v2489_v22  ;;  %v2488_v24 = vmul.f32 0.7978846, %v2486_v23  ;;  %v2918_v22 = vld [vmem:[#allocation3 + $0x2b8] ss:$0 sm:$0xff] }
0x19fc   :  { %3317 = vtanh.f32 %v2488_v24 }
0x1a07   :  { %v3316_v25 = vpop.eup %3315 }
0x1a08   :  { %v2493_v28 = vadd.f32 1.0, %v3316_v25 }
0x1a09   :  { %v3318_v26 = vpop.eup %3317 }
0x1a0a   :  { %v2492_v29 = vadd.f32 1.0, %v3318_v26  ;;  %v2495_v40 = vmul.f32 %v2493_v28, %v2479_v42 }
0x1a0c   :  { %v2494_v30 = vmul.f32 %v2492_v29, %v2478_v53 }
0x1a0e   :  { %3211 = vmatprep.mubr.msk.f32.mxu1 %vm1370_vm13, %v2494_v30 }
0x1a0f   :  { %3212 = vmatmul.mubr.msk.f32.vlgmr.msra.gmra.mxu1 %vm1370_vm13, %v2495_v40  ;;  %vm2803_vm13 = vcmp.eq.s32.totalorder %v3389_v3, 0 }
0x1acf   :  { %v3213_v32 = vpop.f32.mrf.mxu1 }
0x1ad0   :  { %v2587_v33 = vadd.f32 %v3213_v32, %v2909_v31 }
0x1ad1   :  { %v2581_v27 = vpop.f32.mrf.mxu1 }
0x1ad2   :  { %v2582_v2 = vadd.f32 %v2909_v31, %v2581_v27  ;;  %v2591_v34 = vadd.f32 %v2587_v33, %v3687_v60  ;;  %v2807_v60 = vsel %vm2805_vm9, 1, %v3352_v19 }
0x1ad4   :  { %v2597_v35 = vsel %vm302_vm0, %v2591_v34, 0.0  ;;  %v2590_v36 = vadd.f32 %v2582_v2, %v3683_v58  ;;  %v3361_v58 = vmov 2  }
0x1ad5   :  { %2598 = vadd.xlane.f32.xlu0 %v2597_v35  ;;  %3259 = vset.pattern.permute.xlu1 %v3361_v58 }
0x1ad6   :  { %v2594_v37 = vsel %vm302_vm0, %v2590_v36, 0.0  ;;  %3260 = vset.pattern.permute.xlu0 %v3361_v58 }
0x1ad7   :  { %2595 = vadd.xlane.f32.xlu1 %v2594_v37 }
0x1b5e   :  { %v2599_v38 = vpop.xlane.xlu0 %2598 }
0x1b5f   :  { %v2601_v39 = vmul.f32 0.03125, %v2599_v38 }
0x1b60   :  { %v2596_v41 = vpop.xlane.xlu1 %2595 }
0x1b61   :  { %v2603_v43 = vsub.f32 %v2591_v34, %v2601_v39  ;;  %v2600_v44 = vmul.f32 0.03125, %v2596_v41 }
0x1b63   :  { %v2602_v46 = vsub.f32 %v2590_v36, %v2600_v44  ;;  %v2605_v47 = vmul.f32 %v2603_v43, %v2603_v43 }
0x1b65   :  { %v2609_v48 = vsel %vm302_vm0, %v2605_v47, 0.0  ;;  %v2604_v49 = vmul.f32 %v2602_v46, %v2602_v46 }
0x1b66   :  { %2610 = vadd.xlane.f32.xlu0 %v2609_v48 }
0x1b67   :  { %v2606_v50 = vsel %vm302_vm0, %v2604_v49, 0.0 }
0x1b68   :  { %2607 = vadd.xlane.f32.xlu1 %v2606_v50 }
0x1b79   :  { %2809 = vperm.xlu1 %3259, %v2806_v59  }
0x1b7c   :  { %2812 = vperm.xlu0 %3260, %v2807_v60  }
0x1b7d   :  { %3261 = vset.pattern.permute.xlu1 %v3362_v63 }
0x1b7e   :  { %2820 = vperm.xlu1 %3261, %v2806_v59  }
0x1b80   :  { %3262 = vset.pattern.permute.xlu0 %v3362_v63 }
0x1b82   :  { %2823 = vperm.xlu1 %3261, %v2807_v60  }
0x1bef   :  { %v2611_v0 = vpop.xlane.xlu0 %2610 }
0x1bf0   :  { %v2613_v4 = vmul.f32 0.03125, %v2611_v0 }
0x1bf1   :  { %v2608_v5 = vpop.xlane.xlu1 %2607 }
0x1bf2   :  { %v2615_v6 = vadd.f32 1e-12, %v2613_v4  ;;  %v2612_v45 = vmul.f32 0.03125, %v2608_v5 }
0x1bf4   :  { %3319 = vrsqrt.f32 %v2615_v6  ;;  %v2614_v7 = vadd.f32 1e-12, %v2612_v45 }
0x1bf5   :  { %v2810_v15 = vpop.permute.xlu1 %2809 }
0x1bf6   :  { %3321 = vrsqrt.f32 %v2614_v7  ;;  %vm2814_vm10 = vcmp.eq.s32.totalorder %v2810_v15, 1 }
0x1bf7   :  { %v2813_v18 = vpop.permute.xlu0 %2812 }
0x1bf8   :  { %vm2815_vm11 = vcmp.eq.s32.totalorder %v2813_v18, 1 }
0x1bf9   :  { %v2821_v16 = vpop.permute.xlu1 %2820  ;;  %vm2817_vm2 = vmand %vm2803_vm13, %vm2815_vm11 }
0x1bfa   :  { %vm2825_vm15 = vcmp.eq.s32.totalorder %v2821_v16, 1 }
0x1bfb   :  { %vm2827_vm5 = vmand %vm2818_vm14, %vm2825_vm15 }
0x1bfd   :  { %v2824_v20 = vpop.permute.xlu1 %2823 }
0x1bfe   :  { %vm2826_vm12 = vcmp.eq.s32.totalorder %v2824_v20, 1 }
0x1bff   :  { %vm2828_vm3 = vmand %vm2818_vm14, %vm2826_vm12 }
0x1c00   :  { %vm2830_vm7 = vmor %vm2817_vm2, %vm2828_vm3 }
0x1c01   :  { %v3320_v61 = vpop.eup %3319 }
0x1c02   :  { %v2619_v9 = vmul.f32 %v3320_v61, %v2603_v43 }
0x1c03   :  { %v3322_v62 = vpop.eup %3321 }
0x1c04   :  { %v2618_v19 = vmul.f32 %v3322_v62, %v2602_v46  ;;  %v2625_v10 = vmul.f32 %v2912_v8, %v2619_v9 }
0x1c06   :  { %v2624_v1 = vmul.f32 %v2912_v8, %v2618_v19  ;;  %v2631_v13 = vadd.f32 %v2913_v11, %v2625_v10 }
0x1c08   :  { %v2630_v12 = vadd.f32 %v2913_v11, %v2624_v1 }
0x1c0a   :  { %3233 = vmatprep.mubr.msk.f32.mxu0 %vm302_vm0, %v2630_v12 }
0x1c0b   :  { %3234 = vmatmul.mubr.msk.f32.vlgmr.msra.gmra.mxu0 %vm302_vm0, %v2631_v13  ;;  %vm2816_vm0 = vmand %vm2803_vm13, %vm2814_vm10 }
0x1c0c   :  { %vm2829_vm8 = vmor %vm2816_vm0, %vm2827_vm5 }
0x1ccb   :  { %v3235_v21 = vpop.f32.mrf.mxu0 }
0x1ccc   :  { %v2793_v23 = vadd.f32 %v3235_v21, %v3224_v17 }
0x1ccd   :  { %v2787_v24 = vpop.f32.mrf.mxu0 }
0x1cce   :  { %v2802_v25 = vadd.f32 %v2918_v22, %v2793_v23  ;;  %v2788_v26 = vadd.f32 %v2787_v24, %v2706_v14 }
0x1cd0   :  { %v2832_v28 = vsel %vm2830_vm7, -inf, %v2802_v25  ;;  %v2801_v53 = vadd.f32 %v2918_v22, %v2788_v26 }
0x1cd1   :  { %2835 = vst.msk [vmem:[%s3724_s3 + $0x8] sm:$0xff] %vm2833_vm6, %v2832_v28 }
0x1cd2   :  { %v2831_v3 = vsel %vm2829_vm8, -inf, %v2801_v53 }
0x1cd3   :  { %2834 = vst.msk [vmem:[%s3724_s3] sm:$0xff] %vm2833_vm6, %v2831_v3 }
0x1cd4   :  { %2840 = vsyncpa [#allocation4], 1 }

</bundles_post_ra>
